<compile_context>
chip_gen: v5e
topology: v5e:2x2
jax: 0.10.0
libtpu: 0.0.40
codegen_flags: <defaults>
</compile_context>

<pallas_src>
import functools
import numpy as np
import jax
import jax.numpy as jnp
from jax.experimental import pallas as pl
from jax.experimental.pallas import tpu as pltpu


# ----------------------------------------------------------------------------
# SU(n) structure constants (pauli_s_const equivalent), deterministic numpy.
# ----------------------------------------------------------------------------
def pauli_s_const(n):
    """Generalized Gell-Mann basis lambda_a with Tr(l_a l_b) = 2 delta_ab.
    Returns f, d of shape (n^2-1, n^2-1, n^2-1), float32."""
    mats = []
    for j in range(n):                      # symmetric
        for k in range(j + 1, n):
            m = np.zeros((n, n), dtype=np.complex128)
            m[j, k] = 1.0
            m[k, j] = 1.0
            mats.append(m)
    for j in range(n):                      # antisymmetric
        for k in range(j + 1, n):
            m = np.zeros((n, n), dtype=np.complex128)
            m[j, k] = -1j
            m[k, j] = 1j
            mats.append(m)
    for l in range(1, n):                   # diagonal
        m = np.zeros((n, n), dtype=np.complex128)
        for mm in range(l):
            m[mm, mm] = 1.0
        m[l, l] = -l
        m *= np.sqrt(2.0 / (l * (l + 1)))
        mats.append(m)
    lam = np.stack(mats)                    # (D, n, n)
    comm = np.einsum('aij,bjk->abik', lam, lam) - np.einsum('bij,ajk->abik', lam, lam)
    acom = np.einsum('aij,bjk->abik', lam, lam) + np.einsum('bij,ajk->abik', lam, lam)
    f = np.real(np.einsum('abik,cki->abc', comm, lam) / 4j)
    d = np.real(np.einsum('abik,cki->abc', acom, lam) / 4.0)
    return f.astype(np.float32), d.astype(np.float32)


# ----------------------------------------------------------------------------
# Parameter-only Liouvillian construction (hoisted out of the kernel).
# Tiny (D x D) einsums, identical for every batch tile -> done once in JAX.
# ----------------------------------------------------------------------------
def liouvillian_blocks(v_x, v_y, omega, f, d):
    f32 = jnp.float32
    v_x = v_x.astype(f32)
    v_y = v_y.astype(f32)
    omega = omega.astype(f32)
    f = f.astype(f32)
    d = d.astype(f32)
    c_re = jnp.einsum('ki,kj->ij', v_x, v_x) + jnp.einsum('ki,kj->ij', v_y, v_y)
    c_im = jnp.einsum('ki,kj->ij', v_x, v_y) - jnp.einsum('ki,kj->ij', v_y, v_x)
    re_1 = -4.0 * jnp.einsum('mjk,nik,ij->mn', f, f, c_re)
    re_2 = -4.0 * jnp.einsum('mik,njk,ij->mn', f, f, c_re)
    im_1 = 4.0 * jnp.einsum('mjk,nik,ij->mn', f, d, c_im)
    im_2 = -4.0 * jnp.einsum('mik,njk,ij->mn', f, d, c_im)
    d_super = re_1 + re_2 + im_1 + im_2
    tr_id = 4.0 * jnp.einsum('imj,ij->m', f, c_im)
    h_comm = -4.0 * jnp.einsum('ijk,k->ij', f, omega)
    return h_comm + d_super, tr_id          # A (D,D), tr_id (D,)


# ----------------------------------------------------------------------------
# The fused Pallas kernel: per-sample exp(t A) / phi1(t A) with batch on lanes.
# ----------------------------------------------------------------------------
NSQ = 6        # scaling-and-squaring steps (safe default, see correctness note)
NTAYLOR = 8    # Taylor order of the scaled exp / phi1


def _mllp_kernel(D, nsq, ntaylor, t_ref, x_ref, a_ref, trid_ref, out_ref):
    t_row = t_ref[...]                        # (1, TB)  t_b on the lane axis
    a = a_ref[...]                            # (D, D)   Liouvillian block A
    trid = trid_ref[...]                      # (D, 1)   tr_id column

    scale = t_row * (2.0 ** (-nsq))           # (1, TB)  2^-nsq * t_b

    # Column representation of per-sample matrices:
    # cols[n][m, b] = M_b[m, n] ;  each (D, TB) array is 1 vreg per 128 samples.
    z = [a[:, n:n + 1] * scale for n in range(D)]          # Z_b = 2^-nsq t_b A

    def rows_of(cols):
        # Pre-sliced (1, TB) broadcast rows: rows[n][k][0, b] = M_b[k, n].
        return [[cols[n][k:k + 1, :] for k in range(D)] for n in range(D)]

    def bmm(a_cols, b_rows):
        # Per-sample DxD matmul C_b = A_b @ B_b in column representation.
        out = []
        for n in range(D):
            acc = a_cols[0] * b_rows[n][0]
            for k in range(1, D):
                acc = acc + a_cols[k] * b_rows[n][k]
            out.append(acc)
        return out

    # Taylor series of S = exp(Z) - I and Q = phi1(Z) - I.
    z_rows = rows_of(z)                        # hoisted: reused every order
    s = list(z)
    q = [0.5 * zc for zc in z]
    zp = list(z)
    fact = 1.0
    for order in range(2, ntaylor + 1):
        zp = bmm(zp, z_rows)                   # Z^order
        fact *= order
        c_s = 1.0 / fact
        c_q = 1.0 / (fact * (order + 1))
        s = [sc + c_s * zc for sc, zc in zip(s, zp)]
        q = [qc + c_q * zc for qc, zc in zip(q, zp)]

    # Scaling & squaring:
    #   exp(2Z) - I  = 2S + S@S
    #   phi1(2Z) - I = Q + S/2 + S@Q/2
    for _ in range(nsq):
        q_rows = rows_of(q)
        s_rows = rows_of(s)
        sq = bmm(s, q_rows)
        ss = bmm(s, s_rows)
        q = [qc + 0.5 * sc + 0.5 * sqc for qc, sc, sqc in zip(q, s, sq)]
        s = [2.0 * sc + ssc for sc, ssc in zip(s, ss)]

    # out_b = exp(t_b A) @ x_b + t_b * phi1(t_b A) @ tr_id
    x_in = x_ref[...]                          # (D, TB)
    tb_vec = trid * t_row                      # (D, TB) = t_b * tr_id
    acc = x_in + tb_vec                        # identity parts of exp / phi1
    for n in range(D):
        acc = acc + s[n] * x_in[n:n + 1, :] + q[n] * tb_vec[n:n + 1, :]
    out_ref[...] = acc.astype(out_ref.dtype)


# ----------------------------------------------------------------------------
# Wrapper: layout glue + pallas_call (batch on lanes, "parallel" grid axis).
# ----------------------------------------------------------------------------
def mllp_forward_pallas(t, x, v_x, v_y, omega, f, d,
                        *, nsq=NSQ, ntaylor=NTAYLOR, batch_tile=256):
    B, D = x.shape
    f32 = jnp.float32

    # Parameter-only work hoisted out of the kernel (identical for all tiles).
    A, tr_id = liouvillian_blocks(v_x, v_y, omega, f, d)
    A = A.astype(f32)                          # (D, D)
    trid = tr_id.astype(f32).reshape(D, 1)     # (D, 1)

    # --- batch tiling: lanes carry the batch dimension -----------------------
    tb = max(128, (int(batch_tile) // 128) * 128)   # lane-multiple tile, <=256
    b_128 = ((B + 127) // 128) * 128                # full-lane padding
    tb = min(tb, b_128)
    grid_b = (b_128 + tb - 1) // tb
    grid_b = max(grid_b, 2)          # >=2 parallel tiles: keep both v7x cores busy
    if grid_b % 2:
        grid_b += 1                  # even tile count shards evenly across 2 cores
    b_full = grid_b * tb

    # Padded samples carry t=0, x=0 -> exp(0)=I and output rows of exactly 0;
    # they are computed and discarded below.  Keep the padding ZERO-valued.
    t_row = jnp.pad(t.astype(f32).reshape(1, B), ((0, 0), (0, b_full - B)))
    x_t = jnp.pad(x.astype(f32).T, ((0, 0), (0, b_full - B)))

    kern = functools.partial(_mllp_kernel, D, nsq, ntaylor)
    out = pl.pallas_call(
        kern,
        out_shape=jax.ShapeDtypeStruct((D, b_full), f32),
        grid=(grid_b,),
        in_specs=[
            pl.BlockSpec((1, tb), lambda i: (0, i)),   # t      (lane-batched)
            pl.BlockSpec((D, tb), lambda i: (0, i)),   # x^T    (lane-batched)
            pl.BlockSpec((D, D), lambda i: (0, 0)),    # A      (constant)
            pl.BlockSpec((D, 1), lambda i: (0, 0)),    # tr_id  (constant)
        ],
        out_specs=pl.BlockSpec((D, tb), lambda i: (0, i)),
        compiler_params=pltpu.CompilerParams(
            dimension_semantics=("parallel",)),
    )(t_row, x_t, A, trid)
    return out[:, :B].T


# ----------------------------------------------------------------------------
# float64 NumPy reference (mirrors exp_LL.get_L + forward_t exactly)
# ----------------------------------------------------------------------------
def _expm_np(M, nsq=20, order=16):
    A = M / float(2 ** nsq)
    E = np.eye(M.shape[0])
    term = np.eye(M.shape[0])
    for k in range(1, order + 1):
        term = term @ A / k
        E = E + term
    for _ in range(nsq):
        E = E @ E
    return E


def reference_forward_np(t, x, v_x, v_y, omega, f, d):
    t = np.asarray(t, np.float64)
    x = np.asarray(x, np.float64)
    v_x = np.asarray(v_x, np.float64)
    v_y = np.asarray(v_y, np.float64)
    omega = np.asarray(omega, np.float64)
    f = np.asarray(f, np.float64)
    d = np.asarray(d, np.float64)

    c_re = np.einsum('ki,kj->ij', v_x, v_x) + np.einsum('ki,kj->ij', v_y, v_y)
    c_im = np.einsum('ki,kj->ij', v_x, v_y) - np.einsum('ki,kj->ij', v_y, v_x)
    re_1 = -4.0 * np.einsum('mjk,nik,ij->mn', f, f, c_re)
    re_2 = -4.0 * np.einsum('mik,njk,ij->mn', f, f, c_re)
    im_1 = 4.0 * np.einsum('mjk,nik,ij->mn', f, d, c_im)
    im_2 = -4.0 * np.einsum('mik,njk,ij->mn', f, d, c_im)
    d_super = re_1 + re_2 + im_1 + im_2
    tr_id = 4.0 * np.einsum('imj,ij->m', f, c_im)
    h_comm = -4.0 * np.einsum('ijk,k->ij', f, omega)

    Dd = x.shape[1]
    L = np.zeros((Dd + 1, Dd + 1))
    L[1:, 1:] = h_comm + d_super
    L[1:, 0] = tr_id

    outs = []
    for b in range(x.shape[0]):
        E = _expm_np(t[b] * L)
        outs.append(E[1:, 0] + E[1:, 1:] @ x[b])
    return np.stack(outs)


# ----------------------------------------------------------------------------
if __name__ == "__main__":
    data_dim = 3                     # single-qubit coherence vector (n = 2)
    n_hilbert = int(round(np.sqrt(data_dim + 1)))
    B = 8

    f_np, d_np = pauli_s_const(n_hilbert)
    f_j = jnp.asarray(f_np)
    d_j = jnp.asarray(d_np)

    key = jax.random.PRNGKey(0)
    kvx, kvy, kom, kx, kt = jax.random.split(key, 5)

    # mimic exp_LL.__init__ parameter init: kaiming_uniform_(a=10), uniform omega
    bound_v = float(np.sqrt(6.0 / ((1.0 + 10.0 ** 2) * data_dim)))
    v_x = jax.random.uniform(kvx, (data_dim, data_dim), jnp.float32, -bound_v, bound_v)
    v_y = jax.random.uniform(kvy, (data_dim, data_dim), jnp.float32, -bound_v, bound_v)
    bound_o = float(1.0 / np.sqrt(data_dim))
    omega = jax.random.uniform(kom, (data_dim,), jnp.float32, -bound_o, bound_o)

    x = 0.3 * jax.random.normal(kx, (B, data_dim), jnp.float32)
    t = jax.random.uniform(kt, (B,), jnp.float32)     # the step 0 -> t

    out = jax.block_until_ready(
        mllp_forward_pallas(t, x, v_x, v_y, omega, f_j, d_j))

    ref = reference_forward_np(np.asarray(t), np.asarray(x),
                               np.asarray(v_x), np.asarray(v_y),
                               np.asarray(omega), f_np, d_np)
    np.testing.assert_allclose(np.asarray(out), ref.astype(np.float32),
                               rtol=1e-3, atol=1e-3)
    assert np.all(np.isfinite(np.asarray(out)))

    print("KERNEL_OK")
</pallas_src>

<mosaic_0001>
module attributes {stable_mosaic.version = 11 : i64} {
  func.func @_mllp_kernel(%arg0: i32, %arg1: memref<1x128xf32, #tpu.memory_space<vmem>>, %arg2: memref<3x128xf32, #tpu.memory_space<vmem>>, %arg3: memref<3x3xf32, #tpu.memory_space<vmem>>, %arg4: memref<3x1xf32, #tpu.memory_space<vmem>>, %arg5: memref<3x128xf32, #tpu.memory_space<vmem>>) attributes {dimension_semantics = [#tpu.dimension_semantics<parallel>], iteration_bounds = array<i64: 2>, scalar_prefetch = 0 : i64, scratch_operands = 0 : i64, tpu.core_type = #tpu.core_type<tc>, window_params = [{transform_indices = @transform_0, window_bounds = array<i64: 1, 128>}, {transform_indices = @transform_1, window_bounds = array<i64: 3, 128>}, {pipeline_mode = #tpu.pipeline_mode<synchronous>, transform_indices = @transform_2, window_bounds = array<i64: 3, 3>}, {pipeline_mode = #tpu.pipeline_mode<synchronous>, transform_indices = @transform_3, window_bounds = array<i64: 3, 1>}, {transform_indices = @transform_4, window_bounds = array<i64: 3, 128>}]} {
    %c0 = arith.constant 0 : index
    %c0_0 = arith.constant 0 : index
    %0 = vector.load %arg1[%c0, %c0_0] : memref<1x128xf32, #tpu.memory_space<vmem>>, vector<1x128xf32>
    %c0_1 = arith.constant 0 : index
    %c0_2 = arith.constant 0 : index
    %1 = vector.load %arg3[%c0_1, %c0_2] : memref<3x3xf32, #tpu.memory_space<vmem>>, vector<3x3xf32>
    %c0_3 = arith.constant 0 : index
    %c0_4 = arith.constant 0 : index
    %2 = vector.load %arg4[%c0_3, %c0_4] : memref<3x1xf32, #tpu.memory_space<vmem>>, vector<3x1xf32>
    %cst = arith.constant 1.562500e-02 : f32
    %3 = vector.broadcast %cst : f32 to vector<1x128xf32>
    %4 = arith.mulf %0, %3 : vector<1x128xf32>
    %5 = vector.extract_strided_slice %1 {offsets = [0, 0], sizes = [3, 1], strides = [1, 1]} : vector<3x3xf32> to vector<3x1xf32>
    %6 = vector.broadcast %5 : vector<3x1xf32> to vector<3x128xf32>
    %7 = vector.broadcast %4 : vector<1x128xf32> to vector<3x128xf32>
    %8 = arith.mulf %6, %7 : vector<3x128xf32>
    %9 = vector.extract_strided_slice %1 {offsets = [0, 1], sizes = [3, 1], strides = [1, 1]} : vector<3x3xf32> to vector<3x1xf32>
    %10 = vector.broadcast %9 : vector<3x1xf32> to vector<3x128xf32>
    %11 = vector.broadcast %4 : vector<1x128xf32> to vector<3x128xf32>
    %12 = arith.mulf %10, %11 : vector<3x128xf32>
    %13 = vector.extract_strided_slice %1 {offsets = [0, 2], sizes = [3, 1], strides = [1, 1]} : vector<3x3xf32> to vector<3x1xf32>
    %14 = vector.broadcast %13 : vector<3x1xf32> to vector<3x128xf32>
    %15 = vector.broadcast %4 : vector<1x128xf32> to vector<3x128xf32>
    %16 = arith.mulf %14, %15 : vector<3x128xf32>
    %17 = vector.extract_strided_slice %8 {offsets = [0, 0], sizes = [1, 128], strides = [1, 1]} : vector<3x128xf32> to vector<1x128xf32>
    %18 = vector.extract_strided_slice %8 {offsets = [1, 0], sizes = [1, 128], strides = [1, 1]} : vector<3x128xf32> to vector<1x128xf32>
    %19 = vector.extract_strided_slice %8 {offsets = [2, 0], sizes = [1, 128], strides = [1, 1]} : vector<3x128xf32> to vector<1x128xf32>
    %20 = vector.extract_strided_slice %12 {offsets = [0, 0], sizes = [1, 128], strides = [1, 1]} : vector<3x128xf32> to vector<1x128xf32>
    %21 = vector.extract_strided_slice %12 {offsets = [1, 0], sizes = [1, 128], strides = [1, 1]} : vector<3x128xf32> to vector<1x128xf32>
    %22 = vector.extract_strided_slice %12 {offsets = [2, 0], sizes = [1, 128], strides = [1, 1]} : vector<3x128xf32> to vector<1x128xf32>
    %23 = vector.extract_strided_slice %16 {offsets = [0, 0], sizes = [1, 128], strides = [1, 1]} : vector<3x128xf32> to vector<1x128xf32>
    %24 = vector.extract_strided_slice %16 {offsets = [1, 0], sizes = [1, 128], strides = [1, 1]} : vector<3x128xf32> to vector<1x128xf32>
    %25 = vector.extract_strided_slice %16 {offsets = [2, 0], sizes = [1, 128], strides = [1, 1]} : vector<3x128xf32> to vector<1x128xf32>
    %cst_5 = arith.constant 5.000000e-01 : f32
    %26 = vector.broadcast %cst_5 : f32 to vector<3x128xf32>
    %27 = arith.mulf %26, %8 : vector<3x128xf32>
    %cst_6 = arith.constant 5.000000e-01 : f32
    %28 = vector.broadcast %cst_6 : f32 to vector<3x128xf32>
    %29 = arith.mulf %28, %12 : vector<3x128xf32>
    %cst_7 = arith.constant 5.000000e-01 : f32
    %30 = vector.broadcast %cst_7 : f32 to vector<3x128xf32>
    %31 = arith.mulf %30, %16 : vector<3x128xf32>
    %32 = vector.broadcast %17 : vector<1x128xf32> to vector<3x128xf32>
    %33 = arith.mulf %8, %32 : vector<3x128xf32>
    %34 = vector.broadcast %18 : vector<1x128xf32> to vector<3x128xf32>
    %35 = arith.mulf %12, %34 : vector<3x128xf32>
    %36 = arith.addf %33, %35 : vector<3x128xf32>
    %37 = vector.broadcast %19 : vector<1x128xf32> to vector<3x128xf32>
    %38 = arith.mulf %16, %37 : vector<3x128xf32>
    %39 = arith.addf %36, %38 : vector<3x128xf32>
    %40 = vector.broadcast %20 : vector<1x128xf32> to vector<3x128xf32>
    %41 = arith.mulf %8, %40 : vector<3x128xf32>
    %42 = vector.broadcast %21 : vector<1x128xf32> to vector<3x128xf32>
    %43 = arith.mulf %12, %42 : vector<3x128xf32>
    %44 = arith.addf %41, %43 : vector<3x128xf32>
    %45 = vector.broadcast %22 : vector<1x128xf32> to vector<3x128xf32>
    %46 = arith.mulf %16, %45 : vector<3x128xf32>
    %47 = arith.addf %44, %46 : vector<3x128xf32>
    %48 = vector.broadcast %23 : vector<1x128xf32> to vector<3x128xf32>
    %49 = arith.mulf %8, %48 : vector<3x128xf32>
    %50 = vector.broadcast %24 : vector<1x128xf32> to vector<3x128xf32>
    %51 = arith.mulf %12, %50 : vector<3x128xf32>
    %52 = arith.addf %49, %51 : vector<3x128xf32>
    %53 = vector.broadcast %25 : vector<1x128xf32> to vector<3x128xf32>
    %54 = arith.mulf %16, %53 : vector<3x128xf32>
    %55 = arith.addf %52, %54 : vector<3x128xf32>
    %cst_8 = arith.constant 5.000000e-01 : f32
    %56 = vector.broadcast %cst_8 : f32 to vector<3x128xf32>
    %57 = arith.mulf %56, %39 : vector<3x128xf32>
    %58 = arith.addf %8, %57 : vector<3x128xf32>
    %cst_9 = arith.constant 5.000000e-01 : f32
    %59 = vector.broadcast %cst_9 : f32 to vector<3x128xf32>
    %60 = arith.mulf %59, %47 : vector<3x128xf32>
    %61 = arith.addf %12, %60 : vector<3x128xf32>
    %cst_10 = arith.constant 5.000000e-01 : f32
    %62 = vector.broadcast %cst_10 : f32 to vector<3x128xf32>
    %63 = arith.mulf %62, %55 : vector<3x128xf32>
    %64 = arith.addf %16, %63 : vector<3x128xf32>
    %cst_11 = arith.constant 0.166666672 : f32
    %65 = vector.broadcast %cst_11 : f32 to vector<3x128xf32>
    %66 = arith.mulf %65, %39 : vector<3x128xf32>
    %67 = arith.addf %27, %66 : vector<3x128xf32>
    %cst_12 = arith.constant 0.166666672 : f32
    %68 = vector.broadcast %cst_12 : f32 to vector<3x128xf32>
    %69 = arith.mulf %68, %47 : vector<3x128xf32>
    %70 = arith.addf %29, %69 : vector<3x128xf32>
    %cst_13 = arith.constant 0.166666672 : f32
    %71 = vector.broadcast %cst_13 : f32 to vector<3x128xf32>
    %72 = arith.mulf %71, %55 : vector<3x128xf32>
    %73 = arith.addf %31, %72 : vector<3x128xf32>
    %74 = vector.broadcast %17 : vector<1x128xf32> to vector<3x128xf32>
    %75 = arith.mulf %39, %74 : vector<3x128xf32>
    %76 = vector.broadcast %18 : vector<1x128xf32> to vector<3x128xf32>
    %77 = arith.mulf %47, %76 : vector<3x128xf32>
    %78 = arith.addf %75, %77 : vector<3x128xf32>
    %79 = vector.broadcast %19 : vector<1x128xf32> to vector<3x128xf32>
    %80 = arith.mulf %55, %79 : vector<3x128xf32>
    %81 = arith.addf %78, %80 : vector<3x128xf32>
    %82 = vector.broadcast %20 : vector<1x128xf32> to vector<3x128xf32>
    %83 = arith.mulf %39, %82 : vector<3x128xf32>
    %84 = vector.broadcast %21 : vector<1x128xf32> to vector<3x128xf32>
    %85 = arith.mulf %47, %84 : vector<3x128xf32>
    %86 = arith.addf %83, %85 : vector<3x128xf32>
    %87 = vector.broadcast %22 : vector<1x128xf32> to vector<3x128xf32>
    %88 = arith.mulf %55, %87 : vector<3x128xf32>
    %89 = arith.addf %86, %88 : vector<3x128xf32>
    %90 = vector.broadcast %23 : vector<1x128xf32> to vector<3x128xf32>
    %91 = arith.mulf %39, %90 : vector<3x128xf32>
    %92 = vector.broadcast %24 : vector<1x128xf32> to vector<3x128xf32>
    %93 = arith.mulf %47, %92 : vector<3x128xf32>
    %94 = arith.addf %91, %93 : vector<3x128xf32>
    %95 = vector.broadcast %25 : vector<1x128xf32> to vector<3x128xf32>
    %96 = arith.mulf %55, %95 : vector<3x128xf32>
    %97 = arith.addf %94, %96 : vector<3x128xf32>
    %cst_14 = arith.constant 0.166666672 : f32
    %98 = vector.broadcast %cst_14 : f32 to vector<3x128xf32>
    %99 = arith.mulf %98, %81 : vector<3x128xf32>
    %100 = arith.addf %58, %99 : vector<3x128xf32>
    %cst_15 = arith.constant 0.166666672 : f32
    %101 = vector.broadcast %cst_15 : f32 to vector<3x128xf32>
    %102 = arith.mulf %101, %89 : vector<3x128xf32>
    %103 = arith.addf %61, %102 : vector<3x128xf32>
    %cst_16 = arith.constant 0.166666672 : f32
    %104 = vector.broadcast %cst_16 : f32 to vector<3x128xf32>
    %105 = arith.mulf %104, %97 : vector<3x128xf32>
    %106 = arith.addf %64, %105 : vector<3x128xf32>
    %cst_17 = arith.constant 0.0416666679 : f32
    %107 = vector.broadcast %cst_17 : f32 to vector<3x128xf32>
    %108 = arith.mulf %107, %81 : vector<3x128xf32>
    %109 = arith.addf %67, %108 : vector<3x128xf32>
    %cst_18 = arith.constant 0.0416666679 : f32
    %110 = vector.broadcast %cst_18 : f32 to vector<3x128xf32>
    %111 = arith.mulf %110, %89 : vector<3x128xf32>
    %112 = arith.addf %70, %111 : vector<3x128xf32>
    %cst_19 = arith.constant 0.0416666679 : f32
    %113 = vector.broadcast %cst_19 : f32 to vector<3x128xf32>
    %114 = arith.mulf %113, %97 : vector<3x128xf32>
    %115 = arith.addf %73, %114 : vector<3x128xf32>
    %116 = vector.broadcast %17 : vector<1x128xf32> to vector<3x128xf32>
    %117 = arith.mulf %81, %116 : vector<3x128xf32>
    %118 = vector.broadcast %18 : vector<1x128xf32> to vector<3x128xf32>
    %119 = arith.mulf %89, %118 : vector<3x128xf32>
    %120 = arith.addf %117, %119 : vector<3x128xf32>
    %121 = vector.broadcast %19 : vector<1x128xf32> to vector<3x128xf32>
    %122 = arith.mulf %97, %121 : vector<3x128xf32>
    %123 = arith.addf %120, %122 : vector<3x128xf32>
    %124 = vector.broadcast %20 : vector<1x128xf32> to vector<3x128xf32>
    %125 = arith.mulf %81, %124 : vector<3x128xf32>
    %126 = vector.broadcast %21 : vector<1x128xf32> to vector<3x128xf32>
    %127 = arith.mulf %89, %126 : vector<3x128xf32>
    %128 = arith.addf %125, %127 : vector<3x128xf32>
    %129 = vector.broadcast %22 : vector<1x128xf32> to vector<3x128xf32>
    %130 = arith.mulf %97, %129 : vector<3x128xf32>
    %131 = arith.addf %128, %130 : vector<3x128xf32>
    %132 = vector.broadcast %23 : vector<1x128xf32> to vector<3x128xf32>
    %133 = arith.mulf %81, %132 : vector<3x128xf32>
    %134 = vector.broadcast %24 : vector<1x128xf32> to vector<3x128xf32>
    %135 = arith.mulf %89, %134 : vector<3x128xf32>
    %136 = arith.addf %133, %135 : vector<3x128xf32>
    %137 = vector.broadcast %25 : vector<1x128xf32> to vector<3x128xf32>
    %138 = arith.mulf %97, %137 : vector<3x128xf32>
    %139 = arith.addf %136, %138 : vector<3x128xf32>
    %cst_20 = arith.constant 0.0416666679 : f32
    %140 = vector.broadcast %cst_20 : f32 to vector<3x128xf32>
    %141 = arith.mulf %140, %123 : vector<3x128xf32>
    %142 = arith.addf %100, %141 : vector<3x128xf32>
    %cst_21 = arith.constant 0.0416666679 : f32
    %143 = vector.broadcast %cst_21 : f32 to vector<3x128xf32>
    %144 = arith.mulf %143, %131 : vector<3x128xf32>
    %145 = arith.addf %103, %144 : vector<3x128xf32>
    %cst_22 = arith.constant 0.0416666679 : f32
    %146 = vector.broadcast %cst_22 : f32 to vector<3x128xf32>
    %147 = arith.mulf %146, %139 : vector<3x128xf32>
    %148 = arith.addf %106, %147 : vector<3x128xf32>
    %cst_23 = arith.constant 0.00833333377 : f32
    %149 = vector.broadcast %cst_23 : f32 to vector<3x128xf32>
    %150 = arith.mulf %149, %123 : vector<3x128xf32>
    %151 = arith.addf %109, %150 : vector<3x128xf32>
    %cst_24 = arith.constant 0.00833333377 : f32
    %152 = vector.broadcast %cst_24 : f32 to vector<3x128xf32>
    %153 = arith.mulf %152, %131 : vector<3x128xf32>
    %154 = arith.addf %112, %153 : vector<3x128xf32>
    %cst_25 = arith.constant 0.00833333377 : f32
    %155 = vector.broadcast %cst_25 : f32 to vector<3x128xf32>
    %156 = arith.mulf %155, %139 : vector<3x128xf32>
    %157 = arith.addf %115, %156 : vector<3x128xf32>
    %158 = vector.broadcast %17 : vector<1x128xf32> to vector<3x128xf32>
    %159 = arith.mulf %123, %158 : vector<3x128xf32>
    %160 = vector.broadcast %18 : vector<1x128xf32> to vector<3x128xf32>
    %161 = arith.mulf %131, %160 : vector<3x128xf32>
    %162 = arith.addf %159, %161 : vector<3x128xf32>
    %163 = vector.broadcast %19 : vector<1x128xf32> to vector<3x128xf32>
    %164 = arith.mulf %139, %163 : vector<3x128xf32>
    %165 = arith.addf %162, %164 : vector<3x128xf32>
    %166 = vector.broadcast %20 : vector<1x128xf32> to vector<3x128xf32>
    %167 = arith.mulf %123, %166 : vector<3x128xf32>
    %168 = vector.broadcast %21 : vector<1x128xf32> to vector<3x128xf32>
    %169 = arith.mulf %131, %168 : vector<3x128xf32>
    %170 = arith.addf %167, %169 : vector<3x128xf32>
    %171 = vector.broadcast %22 : vector<1x128xf32> to vector<3x128xf32>
    %172 = arith.mulf %139, %171 : vector<3x128xf32>
    %173 = arith.addf %170, %172 : vector<3x128xf32>
    %174 = vector.broadcast %23 : vector<1x128xf32> to vector<3x128xf32>
    %175 = arith.mulf %123, %174 : vector<3x128xf32>
    %176 = vector.broadcast %24 : vector<1x128xf32> to vector<3x128xf32>
    %177 = arith.mulf %131, %176 : vector<3x128xf32>
    %178 = arith.addf %175, %177 : vector<3x128xf32>
    %179 = vector.broadcast %25 : vector<1x128xf32> to vector<3x128xf32>
    %180 = arith.mulf %139, %179 : vector<3x128xf32>
    %181 = arith.addf %178, %180 : vector<3x128xf32>
    %cst_26 = arith.constant 0.00833333377 : f32
    %182 = vector.broadcast %cst_26 : f32 to vector<3x128xf32>
    %183 = arith.mulf %182, %165 : vector<3x128xf32>
    %184 = arith.addf %142, %183 : vector<3x128xf32>
    %cst_27 = arith.constant 0.00833333377 : f32
    %185 = vector.broadcast %cst_27 : f32 to vector<3x128xf32>
    %186 = arith.mulf %185, %173 : vector<3x128xf32>
    %187 = arith.addf %145, %186 : vector<3x128xf32>
    %cst_28 = arith.constant 0.00833333377 : f32
    %188 = vector.broadcast %cst_28 : f32 to vector<3x128xf32>
    %189 = arith.mulf %188, %181 : vector<3x128xf32>
    %190 = arith.addf %148, %189 : vector<3x128xf32>
    %cst_29 = arith.constant 0.00138888892 : f32
    %191 = vector.broadcast %cst_29 : f32 to vector<3x128xf32>
    %192 = arith.mulf %191, %165 : vector<3x128xf32>
    %193 = arith.addf %151, %192 : vector<3x128xf32>
    %cst_30 = arith.constant 0.00138888892 : f32
    %194 = vector.broadcast %cst_30 : f32 to vector<3x128xf32>
    %195 = arith.mulf %194, %173 : vector<3x128xf32>
    %196 = arith.addf %154, %195 : vector<3x128xf32>
    %cst_31 = arith.constant 0.00138888892 : f32
    %197 = vector.broadcast %cst_31 : f32 to vector<3x128xf32>
    %198 = arith.mulf %197, %181 : vector<3x128xf32>
    %199 = arith.addf %157, %198 : vector<3x128xf32>
    %200 = vector.broadcast %17 : vector<1x128xf32> to vector<3x128xf32>
    %201 = arith.mulf %165, %200 : vector<3x128xf32>
    %202 = vector.broadcast %18 : vector<1x128xf32> to vector<3x128xf32>
    %203 = arith.mulf %173, %202 : vector<3x128xf32>
    %204 = arith.addf %201, %203 : vector<3x128xf32>
    %205 = vector.broadcast %19 : vector<1x128xf32> to vector<3x128xf32>
    %206 = arith.mulf %181, %205 : vector<3x128xf32>
    %207 = arith.addf %204, %206 : vector<3x128xf32>
    %208 = vector.broadcast %20 : vector<1x128xf32> to vector<3x128xf32>
    %209 = arith.mulf %165, %208 : vector<3x128xf32>
    %210 = vector.broadcast %21 : vector<1x128xf32> to vector<3x128xf32>
    %211 = arith.mulf %173, %210 : vector<3x128xf32>
    %212 = arith.addf %209, %211 : vector<3x128xf32>
    %213 = vector.broadcast %22 : vector<1x128xf32> to vector<3x128xf32>
    %214 = arith.mulf %181, %213 : vector<3x128xf32>
    %215 = arith.addf %212, %214 : vector<3x128xf32>
    %216 = vector.broadcast %23 : vector<1x128xf32> to vector<3x128xf32>
    %217 = arith.mulf %165, %216 : vector<3x128xf32>
    %218 = vector.broadcast %24 : vector<1x128xf32> to vector<3x128xf32>
    %219 = arith.mulf %173, %218 : vector<3x128xf32>
    %220 = arith.addf %217, %219 : vector<3x128xf32>
    %221 = vector.broadcast %25 : vector<1x128xf32> to vector<3x128xf32>
    %222 = arith.mulf %181, %221 : vector<3x128xf32>
    %223 = arith.addf %220, %222 : vector<3x128xf32>
    %cst_32 = arith.constant 0.00138888892 : f32
    %224 = vector.broadcast %cst_32 : f32 to vector<3x128xf32>
    %225 = arith.mulf %224, %207 : vector<3x128xf32>
    %226 = arith.addf %184, %225 : vector<3x128xf32>
    %cst_33 = arith.constant 0.00138888892 : f32
    %227 = vector.broadcast %cst_33 : f32 to vector<3x128xf32>
    %228 = arith.mulf %227, %215 : vector<3x128xf32>
    %229 = arith.addf %187, %228 : vector<3x128xf32>
    %cst_34 = arith.constant 0.00138888892 : f32
    %230 = vector.broadcast %cst_34 : f32 to vector<3x128xf32>
    %231 = arith.mulf %230, %223 : vector<3x128xf32>
    %232 = arith.addf %190, %231 : vector<3x128xf32>
    %cst_35 = arith.constant 1.98412701E-4 : f32
    %233 = vector.broadcast %cst_35 : f32 to vector<3x128xf32>
    %234 = arith.mulf %233, %207 : vector<3x128xf32>
    %235 = arith.addf %193, %234 : vector<3x128xf32>
    %cst_36 = arith.constant 1.98412701E-4 : f32
    %236 = vector.broadcast %cst_36 : f32 to vector<3x128xf32>
    %237 = arith.mulf %236, %215 : vector<3x128xf32>
    %238 = arith.addf %196, %237 : vector<3x128xf32>
    %cst_37 = arith.constant 1.98412701E-4 : f32
    %239 = vector.broadcast %cst_37 : f32 to vector<3x128xf32>
    %240 = arith.mulf %239, %223 : vector<3x128xf32>
    %241 = arith.addf %199, %240 : vector<3x128xf32>
    %242 = vector.broadcast %17 : vector<1x128xf32> to vector<3x128xf32>
    %243 = arith.mulf %207, %242 : vector<3x128xf32>
    %244 = vector.broadcast %18 : vector<1x128xf32> to vector<3x128xf32>
    %245 = arith.mulf %215, %244 : vector<3x128xf32>
    %246 = arith.addf %243, %245 : vector<3x128xf32>
    %247 = vector.broadcast %19 : vector<1x128xf32> to vector<3x128xf32>
    %248 = arith.mulf %223, %247 : vector<3x128xf32>
    %249 = arith.addf %246, %248 : vector<3x128xf32>
    %250 = vector.broadcast %20 : vector<1x128xf32> to vector<3x128xf32>
    %251 = arith.mulf %207, %250 : vector<3x128xf32>
    %252 = vector.broadcast %21 : vector<1x128xf32> to vector<3x128xf32>
    %253 = arith.mulf %215, %252 : vector<3x128xf32>
    %254 = arith.addf %251, %253 : vector<3x128xf32>
    %255 = vector.broadcast %22 : vector<1x128xf32> to vector<3x128xf32>
    %256 = arith.mulf %223, %255 : vector<3x128xf32>
    %257 = arith.addf %254, %256 : vector<3x128xf32>
    %258 = vector.broadcast %23 : vector<1x128xf32> to vector<3x128xf32>
    %259 = arith.mulf %207, %258 : vector<3x128xf32>
    %260 = vector.broadcast %24 : vector<1x128xf32> to vector<3x128xf32>
    %261 = arith.mulf %215, %260 : vector<3x128xf32>
    %262 = arith.addf %259, %261 : vector<3x128xf32>
    %263 = vector.broadcast %25 : vector<1x128xf32> to vector<3x128xf32>
    %264 = arith.mulf %223, %263 : vector<3x128xf32>
    %265 = arith.addf %262, %264 : vector<3x128xf32>
    %cst_38 = arith.constant 1.98412701E-4 : f32
    %266 = vector.broadcast %cst_38 : f32 to vector<3x128xf32>
    %267 = arith.mulf %266, %249 : vector<3x128xf32>
    %268 = arith.addf %226, %267 : vector<3x128xf32>
    %cst_39 = arith.constant 1.98412701E-4 : f32
    %269 = vector.broadcast %cst_39 : f32 to vector<3x128xf32>
    %270 = arith.mulf %269, %257 : vector<3x128xf32>
    %271 = arith.addf %229, %270 : vector<3x128xf32>
    %cst_40 = arith.constant 1.98412701E-4 : f32
    %272 = vector.broadcast %cst_40 : f32 to vector<3x128xf32>
    %273 = arith.mulf %272, %265 : vector<3x128xf32>
    %274 = arith.addf %232, %273 : vector<3x128xf32>
    %cst_41 = arith.constant 2.48015876E-5 : f32
    %275 = vector.broadcast %cst_41 : f32 to vector<3x128xf32>
    %276 = arith.mulf %275, %249 : vector<3x128xf32>
    %277 = arith.addf %235, %276 : vector<3x128xf32>
    %cst_42 = arith.constant 2.48015876E-5 : f32
    %278 = vector.broadcast %cst_42 : f32 to vector<3x128xf32>
    %279 = arith.mulf %278, %257 : vector<3x128xf32>
    %280 = arith.addf %238, %279 : vector<3x128xf32>
    %cst_43 = arith.constant 2.48015876E-5 : f32
    %281 = vector.broadcast %cst_43 : f32 to vector<3x128xf32>
    %282 = arith.mulf %281, %265 : vector<3x128xf32>
    %283 = arith.addf %241, %282 : vector<3x128xf32>
    %284 = vector.broadcast %17 : vector<1x128xf32> to vector<3x128xf32>
    %285 = arith.mulf %249, %284 : vector<3x128xf32>
    %286 = vector.broadcast %18 : vector<1x128xf32> to vector<3x128xf32>
    %287 = arith.mulf %257, %286 : vector<3x128xf32>
    %288 = arith.addf %285, %287 : vector<3x128xf32>
    %289 = vector.broadcast %19 : vector<1x128xf32> to vector<3x128xf32>
    %290 = arith.mulf %265, %289 : vector<3x128xf32>
    %291 = arith.addf %288, %290 : vector<3x128xf32>
    %292 = vector.broadcast %20 : vector<1x128xf32> to vector<3x128xf32>
    %293 = arith.mulf %249, %292 : vector<3x128xf32>
    %294 = vector.broadcast %21 : vector<1x128xf32> to vector<3x128xf32>
    %295 = arith.mulf %257, %294 : vector<3x128xf32>
    %296 = arith.addf %293, %295 : vector<3x128xf32>
    %297 = vector.broadcast %22 : vector<1x128xf32> to vector<3x128xf32>
    %298 = arith.mulf %265, %297 : vector<3x128xf32>
    %299 = arith.addf %296, %298 : vector<3x128xf32>
    %300 = vector.broadcast %23 : vector<1x128xf32> to vector<3x128xf32>
    %301 = arith.mulf %249, %300 : vector<3x128xf32>
    %302 = vector.broadcast %24 : vector<1x128xf32> to vector<3x128xf32>
    %303 = arith.mulf %257, %302 : vector<3x128xf32>
    %304 = arith.addf %301, %303 : vector<3x128xf32>
    %305 = vector.broadcast %25 : vector<1x128xf32> to vector<3x128xf32>
    %306 = arith.mulf %265, %305 : vector<3x128xf32>
    %307 = arith.addf %304, %306 : vector<3x128xf32>
    %cst_44 = arith.constant 2.48015876E-5 : f32
    %308 = vector.broadcast %cst_44 : f32 to vector<3x128xf32>
    %309 = arith.mulf %308, %291 : vector<3x128xf32>
    %310 = arith.addf %268, %309 : vector<3x128xf32>
    %cst_45 = arith.constant 2.48015876E-5 : f32
    %311 = vector.broadcast %cst_45 : f32 to vector<3x128xf32>
    %312 = arith.mulf %311, %299 : vector<3x128xf32>
    %313 = arith.addf %271, %312 : vector<3x128xf32>
    %cst_46 = arith.constant 2.48015876E-5 : f32
    %314 = vector.broadcast %cst_46 : f32 to vector<3x128xf32>
    %315 = arith.mulf %314, %307 : vector<3x128xf32>
    %316 = arith.addf %274, %315 : vector<3x128xf32>
    %cst_47 = arith.constant 2.75573188E-6 : f32
    %317 = vector.broadcast %cst_47 : f32 to vector<3x128xf32>
    %318 = arith.mulf %317, %291 : vector<3x128xf32>
    %319 = arith.addf %277, %318 : vector<3x128xf32>
    %cst_48 = arith.constant 2.75573188E-6 : f32
    %320 = vector.broadcast %cst_48 : f32 to vector<3x128xf32>
    %321 = arith.mulf %320, %299 : vector<3x128xf32>
    %322 = arith.addf %280, %321 : vector<3x128xf32>
    %cst_49 = arith.constant 2.75573188E-6 : f32
    %323 = vector.broadcast %cst_49 : f32 to vector<3x128xf32>
    %324 = arith.mulf %323, %307 : vector<3x128xf32>
    %325 = arith.addf %283, %324 : vector<3x128xf32>
    %326 = vector.extract_strided_slice %319 {offsets = [0, 0], sizes = [1, 128], strides = [1, 1]} : vector<3x128xf32> to vector<1x128xf32>
    %327 = vector.extract_strided_slice %319 {offsets = [1, 0], sizes = [1, 128], strides = [1, 1]} : vector<3x128xf32> to vector<1x128xf32>
    %328 = vector.extract_strided_slice %319 {offsets = [2, 0], sizes = [1, 128], strides = [1, 1]} : vector<3x128xf32> to vector<1x128xf32>
    %329 = vector.extract_strided_slice %322 {offsets = [0, 0], sizes = [1, 128], strides = [1, 1]} : vector<3x128xf32> to vector<1x128xf32>
    %330 = vector.extract_strided_slice %322 {offsets = [1, 0], sizes = [1, 128], strides = [1, 1]} : vector<3x128xf32> to vector<1x128xf32>
    %331 = vector.extract_strided_slice %322 {offsets = [2, 0], sizes = [1, 128], strides = [1, 1]} : vector<3x128xf32> to vector<1x128xf32>
    %332 = vector.extract_strided_slice %325 {offsets = [0, 0], sizes = [1, 128], strides = [1, 1]} : vector<3x128xf32> to vector<1x128xf32>
    %333 = vector.extract_strided_slice %325 {offsets = [1, 0], sizes = [1, 128], strides = [1, 1]} : vector<3x128xf32> to vector<1x128xf32>
    %334 = vector.extract_strided_slice %325 {offsets = [2, 0], sizes = [1, 128], strides = [1, 1]} : vector<3x128xf32> to vector<1x128xf32>
    %335 = vector.extract_strided_slice %310 {offsets = [0, 0], sizes = [1, 128], strides = [1, 1]} : vector<3x128xf32> to vector<1x128xf32>
    %336 = vector.extract_strided_slice %310 {offsets = [1, 0], sizes = [1, 128], strides = [1, 1]} : vector<3x128xf32> to vector<1x128xf32>
    %337 = vector.extract_strided_slice %310 {offsets = [2, 0], sizes = [1, 128], strides = [1, 1]} : vector<3x128xf32> to vector<1x128xf32>
    %338 = vector.extract_strided_slice %313 {offsets = [0, 0], sizes = [1, 128], strides = [1, 1]} : vector<3x128xf32> to vector<1x128xf32>
    %339 = vector.extract_strided_slice %313 {offsets = [1, 0], sizes = [1, 128], strides = [1, 1]} : vector<3x128xf32> to vector<1x128xf32>
    %340 = vector.extract_strided_slice %313 {offsets = [2, 0], sizes = [1, 128], strides = [1, 1]} : vector<3x128xf32> to vector<1x128xf32>
    %341 = vector.extract_strided_slice %316 {offsets = [0, 0], sizes = [1, 128], strides = [1, 1]} : vector<3x128xf32> to vector<1x128xf32>
    %342 = vector.extract_strided_slice %316 {offsets = [1, 0], sizes = [1, 128], strides = [1, 1]} : vector<3x128xf32> to vector<1x128xf32>
    %343 = vector.extract_strided_slice %316 {offsets = [2, 0], sizes = [1, 128], strides = [1, 1]} : vector<3x128xf32> to vector<1x128xf32>
    %344 = vector.broadcast %326 : vector<1x128xf32> to vector<3x128xf32>
    %345 = arith.mulf %310, %344 : vector<3x128xf32>
    %346 = vector.broadcast %327 : vector<1x128xf32> to vector<3x128xf32>
    %347 = arith.mulf %313, %346 : vector<3x128xf32>
    %348 = arith.addf %345, %347 : vector<3x128xf32>
    %349 = vector.broadcast %328 : vector<1x128xf32> to vector<3x128xf32>
    %350 = arith.mulf %316, %349 : vector<3x128xf32>
    %351 = arith.addf %348, %350 : vector<3x128xf32>
    %352 = vector.broadcast %329 : vector<1x128xf32> to vector<3x128xf32>
    %353 = arith.mulf %310, %352 : vector<3x128xf32>
    %354 = vector.broadcast %330 : vector<1x128xf32> to vector<3x128xf32>
    %355 = arith.mulf %313, %354 : vector<3x128xf32>
    %356 = arith.addf %353, %355 : vector<3x128xf32>
    %357 = vector.broadcast %331 : vector<1x128xf32> to vector<3x128xf32>
    %358 = arith.mulf %316, %357 : vector<3x128xf32>
    %359 = arith.addf %356, %358 : vector<3x128xf32>
    %360 = vector.broadcast %332 : vector<1x128xf32> to vector<3x128xf32>
    %361 = arith.mulf %310, %360 : vector<3x128xf32>
    %362 = vector.broadcast %333 : vector<1x128xf32> to vector<3x128xf32>
    %363 = arith.mulf %313, %362 : vector<3x128xf32>
    %364 = arith.addf %361, %363 : vector<3x128xf32>
    %365 = vector.broadcast %334 : vector<1x128xf32> to vector<3x128xf32>
    %366 = arith.mulf %316, %365 : vector<3x128xf32>
    %367 = arith.addf %364, %366 : vector<3x128xf32>
    %368 = vector.broadcast %335 : vector<1x128xf32> to vector<3x128xf32>
    %369 = arith.mulf %310, %368 : vector<3x128xf32>
    %370 = vector.broadcast %336 : vector<1x128xf32> to vector<3x128xf32>
    %371 = arith.mulf %313, %370 : vector<3x128xf32>
    %372 = arith.addf %369, %371 : vector<3x128xf32>
    %373 = vector.broadcast %337 : vector<1x128xf32> to vector<3x128xf32>
    %374 = arith.mulf %316, %373 : vector<3x128xf32>
    %375 = arith.addf %372, %374 : vector<3x128xf32>
    %376 = vector.broadcast %338 : vector<1x128xf32> to vector<3x128xf32>
    %377 = arith.mulf %310, %376 : vector<3x128xf32>
    %378 = vector.broadcast %339 : vector<1x128xf32> to vector<3x128xf32>
    %379 = arith.mulf %313, %378 : vector<3x128xf32>
    %380 = arith.addf %377, %379 : vector<3x128xf32>
    %381 = vector.broadcast %340 : vector<1x128xf32> to vector<3x128xf32>
    %382 = arith.mulf %316, %381 : vector<3x128xf32>
    %383 = arith.addf %380, %382 : vector<3x128xf32>
    %384 = vector.broadcast %341 : vector<1x128xf32> to vector<3x128xf32>
    %385 = arith.mulf %310, %384 : vector<3x128xf32>
    %386 = vector.broadcast %342 : vector<1x128xf32> to vector<3x128xf32>
    %387 = arith.mulf %313, %386 : vector<3x128xf32>
    %388 = arith.addf %385, %387 : vector<3x128xf32>
    %389 = vector.broadcast %343 : vector<1x128xf32> to vector<3x128xf32>
    %390 = arith.mulf %316, %389 : vector<3x128xf32>
    %391 = arith.addf %388, %390 : vector<3x128xf32>
    %cst_50 = arith.constant 5.000000e-01 : f32
    %392 = vector.broadcast %cst_50 : f32 to vector<3x128xf32>
    %393 = arith.mulf %392, %310 : vector<3x128xf32>
    %394 = arith.addf %319, %393 : vector<3x128xf32>
    %cst_51 = arith.constant 5.000000e-01 : f32
    %395 = vector.broadcast %cst_51 : f32 to vector<3x128xf32>
    %396 = arith.mulf %395, %351 : vector<3x128xf32>
    %397 = arith.addf %394, %396 : vector<3x128xf32>
    %cst_52 = arith.constant 5.000000e-01 : f32
    %398 = vector.broadcast %cst_52 : f32 to vector<3x128xf32>
    %399 = arith.mulf %398, %313 : vector<3x128xf32>
    %400 = arith.addf %322, %399 : vector<3x128xf32>
    %cst_53 = arith.constant 5.000000e-01 : f32
    %401 = vector.broadcast %cst_53 : f32 to vector<3x128xf32>
    %402 = arith.mulf %401, %359 : vector<3x128xf32>
    %403 = arith.addf %400, %402 : vector<3x128xf32>
    %cst_54 = arith.constant 5.000000e-01 : f32
    %404 = vector.broadcast %cst_54 : f32 to vector<3x128xf32>
    %405 = arith.mulf %404, %316 : vector<3x128xf32>
    %406 = arith.addf %325, %405 : vector<3x128xf32>
    %cst_55 = arith.constant 5.000000e-01 : f32
    %407 = vector.broadcast %cst_55 : f32 to vector<3x128xf32>
    %408 = arith.mulf %407, %367 : vector<3x128xf32>
    %409 = arith.addf %406, %408 : vector<3x128xf32>
    %cst_56 = arith.constant 2.000000e+00 : f32
    %410 = vector.broadcast %cst_56 : f32 to vector<3x128xf32>
    %411 = arith.mulf %410, %310 : vector<3x128xf32>
    %412 = arith.addf %411, %375 : vector<3x128xf32>
    %cst_57 = arith.constant 2.000000e+00 : f32
    %413 = vector.broadcast %cst_57 : f32 to vector<3x128xf32>
    %414 = arith.mulf %413, %313 : vector<3x128xf32>
    %415 = arith.addf %414, %383 : vector<3x128xf32>
    %cst_58 = arith.constant 2.000000e+00 : f32
    %416 = vector.broadcast %cst_58 : f32 to vector<3x128xf32>
    %417 = arith.mulf %416, %316 : vector<3x128xf32>
    %418 = arith.addf %417, %391 : vector<3x128xf32>
    %419 = vector.extract_strided_slice %397 {offsets = [0, 0], sizes = [1, 128], strides = [1, 1]} : vector<3x128xf32> to vector<1x128xf32>
    %420 = vector.extract_strided_slice %397 {offsets = [1, 0], sizes = [1, 128], strides = [1, 1]} : vector<3x128xf32> to vector<1x128xf32>
    %421 = vector.extract_strided_slice %397 {offsets = [2, 0], sizes = [1, 128], strides = [1, 1]} : vector<3x128xf32> to vector<1x128xf32>
    %422 = vector.extract_strided_slice %403 {offsets = [0, 0], sizes = [1, 128], strides = [1, 1]} : vector<3x128xf32> to vector<1x128xf32>
    %423 = vector.extract_strided_slice %403 {offsets = [1, 0], sizes = [1, 128], strides = [1, 1]} : vector<3x128xf32> to vector<1x128xf32>
    %424 = vector.extract_strided_slice %403 {offsets = [2, 0], sizes = [1, 128], strides = [1, 1]} : vector<3x128xf32> to vector<1x128xf32>
    %425 = vector.extract_strided_slice %409 {offsets = [0, 0], sizes = [1, 128], strides = [1, 1]} : vector<3x128xf32> to vector<1x128xf32>
    %426 = vector.extract_strided_slice %409 {offsets = [1, 0], sizes = [1, 128], strides = [1, 1]} : vector<3x128xf32> to vector<1x128xf32>
    %427 = vector.extract_strided_slice %409 {offsets = [2, 0], sizes = [1, 128], strides = [1, 1]} : vector<3x128xf32> to vector<1x128xf32>
    %428 = vector.extract_strided_slice %412 {offsets = [0, 0], sizes = [1, 128], strides = [1, 1]} : vector<3x128xf32> to vector<1x128xf32>
    %429 = vector.extract_strided_slice %412 {offsets = [1, 0], sizes = [1, 128], strides = [1, 1]} : vector<3x128xf32> to vector<1x128xf32>
    %430 = vector.extract_strided_slice %412 {offsets = [2, 0], sizes = [1, 128], strides = [1, 1]} : vector<3x128xf32> to vector<1x128xf32>
    %431 = vector.extract_strided_slice %415 {offsets = [0, 0], sizes = [1, 128], strides = [1, 1]} : vector<3x128xf32> to vector<1x128xf32>
    %432 = vector.extract_strided_slice %415 {offsets = [1, 0], sizes = [1, 128], strides = [1, 1]} : vector<3x128xf32> to vector<1x128xf32>
    %433 = vector.extract_strided_slice %415 {offsets = [2, 0], sizes = [1, 128], strides = [1, 1]} : vector<3x128xf32> to vector<1x128xf32>
    %434 = vector.extract_strided_slice %418 {offsets = [0, 0], sizes = [1, 128], strides = [1, 1]} : vector<3x128xf32> to vector<1x128xf32>
    %435 = vector.extract_strided_slice %418 {offsets = [1, 0], sizes = [1, 128], strides = [1, 1]} : vector<3x128xf32> to vector<1x128xf32>
    %436 = vector.extract_strided_slice %418 {offsets = [2, 0], sizes = [1, 128], strides = [1, 1]} : vector<3x128xf32> to vector<1x128xf32>
    %437 = vector.broadcast %419 : vector<1x128xf32> to vector<3x128xf32>
    %438 = arith.mulf %412, %437 : vector<3x128xf32>
    %439 = vector.broadcast %420 : vector<1x128xf32> to vector<3x128xf32>
    %440 = arith.mulf %415, %439 : vector<3x128xf32>
    %441 = arith.addf %438, %440 : vector<3x128xf32>
    %442 = vector.broadcast %421 : vector<1x128xf32> to vector<3x128xf32>
    %443 = arith.mulf %418, %442 : vector<3x128xf32>
    %444 = arith.addf %441, %443 : vector<3x128xf32>
    %445 = vector.broadcast %422 : vector<1x128xf32> to vector<3x128xf32>
    %446 = arith.mulf %412, %445 : vector<3x128xf32>
    %447 = vector.broadcast %423 : vector<1x128xf32> to vector<3x128xf32>
    %448 = arith.mulf %415, %447 : vector<3x128xf32>
    %449 = arith.addf %446, %448 : vector<3x128xf32>
    %450 = vector.broadcast %424 : vector<1x128xf32> to vector<3x128xf32>
    %451 = arith.mulf %418, %450 : vector<3x128xf32>
    %452 = arith.addf %449, %451 : vector<3x128xf32>
    %453 = vector.broadcast %425 : vector<1x128xf32> to vector<3x128xf32>
    %454 = arith.mulf %412, %453 : vector<3x128xf32>
    %455 = vector.broadcast %426 : vector<1x128xf32> to vector<3x128xf32>
    %456 = arith.mulf %415, %455 : vector<3x128xf32>
    %457 = arith.addf %454, %456 : vector<3x128xf32>
    %458 = vector.broadcast %427 : vector<1x128xf32> to vector<3x128xf32>
    %459 = arith.mulf %418, %458 : vector<3x128xf32>
    %460 = arith.addf %457, %459 : vector<3x128xf32>
    %461 = vector.broadcast %428 : vector<1x128xf32> to vector<3x128xf32>
    %462 = arith.mulf %412, %461 : vector<3x128xf32>
    %463 = vector.broadcast %429 : vector<1x128xf32> to vector<3x128xf32>
    %464 = arith.mulf %415, %463 : vector<3x128xf32>
    %465 = arith.addf %462, %464 : vector<3x128xf32>
    %466 = vector.broadcast %430 : vector<1x128xf32> to vector<3x128xf32>
    %467 = arith.mulf %418, %466 : vector<3x128xf32>
    %468 = arith.addf %465, %467 : vector<3x128xf32>
    %469 = vector.broadcast %431 : vector<1x128xf32> to vector<3x128xf32>
    %470 = arith.mulf %412, %469 : vector<3x128xf32>
    %471 = vector.broadcast %432 : vector<1x128xf32> to vector<3x128xf32>
    %472 = arith.mulf %415, %471 : vector<3x128xf32>
    %473 = arith.addf %470, %472 : vector<3x128xf32>
    %474 = vector.broadcast %433 : vector<1x128xf32> to vector<3x128xf32>
    %475 = arith.mulf %418, %474 : vector<3x128xf32>
    %476 = arith.addf %473, %475 : vector<3x128xf32>
    %477 = vector.broadcast %434 : vector<1x128xf32> to vector<3x128xf32>
    %478 = arith.mulf %412, %477 : vector<3x128xf32>
    %479 = vector.broadcast %435 : vector<1x128xf32> to vector<3x128xf32>
    %480 = arith.mulf %415, %479 : vector<3x128xf32>
    %481 = arith.addf %478, %480 : vector<3x128xf32>
    %482 = vector.broadcast %436 : vector<1x128xf32> to vector<3x128xf32>
    %483 = arith.mulf %418, %482 : vector<3x128xf32>
    %484 = arith.addf %481, %483 : vector<3x128xf32>
    %cst_59 = arith.constant 5.000000e-01 : f32
    %485 = vector.broadcast %cst_59 : f32 to vector<3x128xf32>
    %486 = arith.mulf %485, %412 : vector<3x128xf32>
    %487 = arith.addf %397, %486 : vector<3x128xf32>
    %cst_60 = arith.constant 5.000000e-01 : f32
    %488 = vector.broadcast %cst_60 : f32 to vector<3x128xf32>
    %489 = arith.mulf %488, %444 : vector<3x128xf32>
    %490 = arith.addf %487, %489 : vector<3x128xf32>
    %cst_61 = arith.constant 5.000000e-01 : f32
    %491 = vector.broadcast %cst_61 : f32 to vector<3x128xf32>
    %492 = arith.mulf %491, %415 : vector<3x128xf32>
    %493 = arith.addf %403, %492 : vector<3x128xf32>
    %cst_62 = arith.constant 5.000000e-01 : f32
    %494 = vector.broadcast %cst_62 : f32 to vector<3x128xf32>
    %495 = arith.mulf %494, %452 : vector<3x128xf32>
    %496 = arith.addf %493, %495 : vector<3x128xf32>
    %cst_63 = arith.constant 5.000000e-01 : f32
    %497 = vector.broadcast %cst_63 : f32 to vector<3x128xf32>
    %498 = arith.mulf %497, %418 : vector<3x128xf32>
    %499 = arith.addf %409, %498 : vector<3x128xf32>
    %cst_64 = arith.constant 5.000000e-01 : f32
    %500 = vector.broadcast %cst_64 : f32 to vector<3x128xf32>
    %501 = arith.mulf %500, %460 : vector<3x128xf32>
    %502 = arith.addf %499, %501 : vector<3x128xf32>
    %cst_65 = arith.constant 2.000000e+00 : f32
    %503 = vector.broadcast %cst_65 : f32 to vector<3x128xf32>
    %504 = arith.mulf %503, %412 : vector<3x128xf32>
    %505 = arith.addf %504, %468 : vector<3x128xf32>
    %cst_66 = arith.constant 2.000000e+00 : f32
    %506 = vector.broadcast %cst_66 : f32 to vector<3x128xf32>
    %507 = arith.mulf %506, %415 : vector<3x128xf32>
    %508 = arith.addf %507, %476 : vector<3x128xf32>
    %cst_67 = arith.constant 2.000000e+00 : f32
    %509 = vector.broadcast %cst_67 : f32 to vector<3x128xf32>
    %510 = arith.mulf %509, %418 : vector<3x128xf32>
    %511 = arith.addf %510, %484 : vector<3x128xf32>
    %512 = vector.extract_strided_slice %490 {offsets = [0, 0], sizes = [1, 128], strides = [1, 1]} : vector<3x128xf32> to vector<1x128xf32>
    %513 = vector.extract_strided_slice %490 {offsets = [1, 0], sizes = [1, 128], strides = [1, 1]} : vector<3x128xf32> to vector<1x128xf32>
    %514 = vector.extract_strided_slice %490 {offsets = [2, 0], sizes = [1, 128], strides = [1, 1]} : vector<3x128xf32> to vector<1x128xf32>
    %515 = vector.extract_strided_slice %496 {offsets = [0, 0], sizes = [1, 128], strides = [1, 1]} : vector<3x128xf32> to vector<1x128xf32>
    %516 = vector.extract_strided_slice %496 {offsets = [1, 0], sizes = [1, 128], strides = [1, 1]} : vector<3x128xf32> to vector<1x128xf32>
    %517 = vector.extract_strided_slice %496 {offsets = [2, 0], sizes = [1, 128], strides = [1, 1]} : vector<3x128xf32> to vector<1x128xf32>
    %518 = vector.extract_strided_slice %502 {offsets = [0, 0], sizes = [1, 128], strides = [1, 1]} : vector<3x128xf32> to vector<1x128xf32>
    %519 = vector.extract_strided_slice %502 {offsets = [1, 0], sizes = [1, 128], strides = [1, 1]} : vector<3x128xf32> to vector<1x128xf32>
    %520 = vector.extract_strided_slice %502 {offsets = [2, 0], sizes = [1, 128], strides = [1, 1]} : vector<3x128xf32> to vector<1x128xf32>
    %521 = vector.extract_strided_slice %505 {offsets = [0, 0], sizes = [1, 128], strides = [1, 1]} : vector<3x128xf32> to vector<1x128xf32>
    %522 = vector.extract_strided_slice %505 {offsets = [1, 0], sizes = [1, 128], strides = [1, 1]} : vector<3x128xf32> to vector<1x128xf32>
    %523 = vector.extract_strided_slice %505 {offsets = [2, 0], sizes = [1, 128], strides = [1, 1]} : vector<3x128xf32> to vector<1x128xf32>
    %524 = vector.extract_strided_slice %508 {offsets = [0, 0], sizes = [1, 128], strides = [1, 1]} : vector<3x128xf32> to vector<1x128xf32>
    %525 = vector.extract_strided_slice %508 {offsets = [1, 0], sizes = [1, 128], strides = [1, 1]} : vector<3x128xf32> to vector<1x128xf32>
    %526 = vector.extract_strided_slice %508 {offsets = [2, 0], sizes = [1, 128], strides = [1, 1]} : vector<3x128xf32> to vector<1x128xf32>
    %527 = vector.extract_strided_slice %511 {offsets = [0, 0], sizes = [1, 128], strides = [1, 1]} : vector<3x128xf32> to vector<1x128xf32>
    %528 = vector.extract_strided_slice %511 {offsets = [1, 0], sizes = [1, 128], strides = [1, 1]} : vector<3x128xf32> to vector<1x128xf32>
    %529 = vector.extract_strided_slice %511 {offsets = [2, 0], sizes = [1, 128], strides = [1, 1]} : vector<3x128xf32> to vector<1x128xf32>
    %530 = vector.broadcast %512 : vector<1x128xf32> to vector<3x128xf32>
    %531 = arith.mulf %505, %530 : vector<3x128xf32>
    %532 = vector.broadcast %513 : vector<1x128xf32> to vector<3x128xf32>
    %533 = arith.mulf %508, %532 : vector<3x128xf32>
    %534 = arith.addf %531, %533 : vector<3x128xf32>
    %535 = vector.broadcast %514 : vector<1x128xf32> to vector<3x128xf32>
    %536 = arith.mulf %511, %535 : vector<3x128xf32>
    %537 = arith.addf %534, %536 : vector<3x128xf32>
    %538 = vector.broadcast %515 : vector<1x128xf32> to vector<3x128xf32>
    %539 = arith.mulf %505, %538 : vector<3x128xf32>
    %540 = vector.broadcast %516 : vector<1x128xf32> to vector<3x128xf32>
    %541 = arith.mulf %508, %540 : vector<3x128xf32>
    %542 = arith.addf %539, %541 : vector<3x128xf32>
    %543 = vector.broadcast %517 : vector<1x128xf32> to vector<3x128xf32>
    %544 = arith.mulf %511, %543 : vector<3x128xf32>
    %545 = arith.addf %542, %544 : vector<3x128xf32>
    %546 = vector.broadcast %518 : vector<1x128xf32> to vector<3x128xf32>
    %547 = arith.mulf %505, %546 : vector<3x128xf32>
    %548 = vector.broadcast %519 : vector<1x128xf32> to vector<3x128xf32>
    %549 = arith.mulf %508, %548 : vector<3x128xf32>
    %550 = arith.addf %547, %549 : vector<3x128xf32>
    %551 = vector.broadcast %520 : vector<1x128xf32> to vector<3x128xf32>
    %552 = arith.mulf %511, %551 : vector<3x128xf32>
    %553 = arith.addf %550, %552 : vector<3x128xf32>
    %554 = vector.broadcast %521 : vector<1x128xf32> to vector<3x128xf32>
    %555 = arith.mulf %505, %554 : vector<3x128xf32>
    %556 = vector.broadcast %522 : vector<1x128xf32> to vector<3x128xf32>
    %557 = arith.mulf %508, %556 : vector<3x128xf32>
    %558 = arith.addf %555, %557 : vector<3x128xf32>
    %559 = vector.broadcast %523 : vector<1x128xf32> to vector<3x128xf32>
    %560 = arith.mulf %511, %559 : vector<3x128xf32>
    %561 = arith.addf %558, %560 : vector<3x128xf32>
    %562 = vector.broadcast %524 : vector<1x128xf32> to vector<3x128xf32>
    %563 = arith.mulf %505, %562 : vector<3x128xf32>
    %564 = vector.broadcast %525 : vector<1x128xf32> to vector<3x128xf32>
    %565 = arith.mulf %508, %564 : vector<3x128xf32>
    %566 = arith.addf %563, %565 : vector<3x128xf32>
    %567 = vector.broadcast %526 : vector<1x128xf32> to vector<3x128xf32>
    %568 = arith.mulf %511, %567 : vector<3x128xf32>
    %569 = arith.addf %566, %568 : vector<3x128xf32>
    %570 = vector.broadcast %527 : vector<1x128xf32> to vector<3x128xf32>
    %571 = arith.mulf %505, %570 : vector<3x128xf32>
    %572 = vector.broadcast %528 : vector<1x128xf32> to vector<3x128xf32>
    %573 = arith.mulf %508, %572 : vector<3x128xf32>
    %574 = arith.addf %571, %573 : vector<3x128xf32>
    %575 = vector.broadcast %529 : vector<1x128xf32> to vector<3x128xf32>
    %576 = arith.mulf %511, %575 : vector<3x128xf32>
    %577 = arith.addf %574, %576 : vector<3x128xf32>
    %cst_68 = arith.constant 5.000000e-01 : f32
    %578 = vector.broadcast %cst_68 : f32 to vector<3x128xf32>
    %579 = arith.mulf %578, %505 : vector<3x128xf32>
    %580 = arith.addf %490, %579 : vector<3x128xf32>
    %cst_69 = arith.constant 5.000000e-01 : f32
    %581 = vector.broadcast %cst_69 : f32 to vector<3x128xf32>
    %582 = arith.mulf %581, %537 : vector<3x128xf32>
    %583 = arith.addf %580, %582 : vector<3x128xf32>
    %cst_70 = arith.constant 5.000000e-01 : f32
    %584 = vector.broadcast %cst_70 : f32 to vector<3x128xf32>
    %585 = arith.mulf %584, %508 : vector<3x128xf32>
    %586 = arith.addf %496, %585 : vector<3x128xf32>
    %cst_71 = arith.constant 5.000000e-01 : f32
    %587 = vector.broadcast %cst_71 : f32 to vector<3x128xf32>
    %588 = arith.mulf %587, %545 : vector<3x128xf32>
    %589 = arith.addf %586, %588 : vector<3x128xf32>
    %cst_72 = arith.constant 5.000000e-01 : f32
    %590 = vector.broadcast %cst_72 : f32 to vector<3x128xf32>
    %591 = arith.mulf %590, %511 : vector<3x128xf32>
    %592 = arith.addf %502, %591 : vector<3x128xf32>
    %cst_73 = arith.constant 5.000000e-01 : f32
    %593 = vector.broadcast %cst_73 : f32 to vector<3x128xf32>
    %594 = arith.mulf %593, %553 : vector<3x128xf32>
    %595 = arith.addf %592, %594 : vector<3x128xf32>
    %cst_74 = arith.constant 2.000000e+00 : f32
    %596 = vector.broadcast %cst_74 : f32 to vector<3x128xf32>
    %597 = arith.mulf %596, %505 : vector<3x128xf32>
    %598 = arith.addf %597, %561 : vector<3x128xf32>
    %cst_75 = arith.constant 2.000000e+00 : f32
    %599 = vector.broadcast %cst_75 : f32 to vector<3x128xf32>
    %600 = arith.mulf %599, %508 : vector<3x128xf32>
    %601 = arith.addf %600, %569 : vector<3x128xf32>
    %cst_76 = arith.constant 2.000000e+00 : f32
    %602 = vector.broadcast %cst_76 : f32 to vector<3x128xf32>
    %603 = arith.mulf %602, %511 : vector<3x128xf32>
    %604 = arith.addf %603, %577 : vector<3x128xf32>
    %605 = vector.extract_strided_slice %583 {offsets = [0, 0], sizes = [1, 128], strides = [1, 1]} : vector<3x128xf32> to vector<1x128xf32>
    %606 = vector.extract_strided_slice %583 {offsets = [1, 0], sizes = [1, 128], strides = [1, 1]} : vector<3x128xf32> to vector<1x128xf32>
    %607 = vector.extract_strided_slice %583 {offsets = [2, 0], sizes = [1, 128], strides = [1, 1]} : vector<3x128xf32> to vector<1x128xf32>
    %608 = vector.extract_strided_slice %589 {offsets = [0, 0], sizes = [1, 128], strides = [1, 1]} : vector<3x128xf32> to vector<1x128xf32>
    %609 = vector.extract_strided_slice %589 {offsets = [1, 0], sizes = [1, 128], strides = [1, 1]} : vector<3x128xf32> to vector<1x128xf32>
    %610 = vector.extract_strided_slice %589 {offsets = [2, 0], sizes = [1, 128], strides = [1, 1]} : vector<3x128xf32> to vector<1x128xf32>
    %611 = vector.extract_strided_slice %595 {offsets = [0, 0], sizes = [1, 128], strides = [1, 1]} : vector<3x128xf32> to vector<1x128xf32>
    %612 = vector.extract_strided_slice %595 {offsets = [1, 0], sizes = [1, 128], strides = [1, 1]} : vector<3x128xf32> to vector<1x128xf32>
    %613 = vector.extract_strided_slice %595 {offsets = [2, 0], sizes = [1, 128], strides = [1, 1]} : vector<3x128xf32> to vector<1x128xf32>
    %614 = vector.extract_strided_slice %598 {offsets = [0, 0], sizes = [1, 128], strides = [1, 1]} : vector<3x128xf32> to vector<1x128xf32>
    %615 = vector.extract_strided_slice %598 {offsets = [1, 0], sizes = [1, 128], strides = [1, 1]} : vector<3x128xf32> to vector<1x128xf32>
    %616 = vector.extract_strided_slice %598 {offsets = [2, 0], sizes = [1, 128], strides = [1, 1]} : vector<3x128xf32> to vector<1x128xf32>
    %617 = vector.extract_strided_slice %601 {offsets = [0, 0], sizes = [1, 128], strides = [1, 1]} : vector<3x128xf32> to vector<1x128xf32>
    %618 = vector.extract_strided_slice %601 {offsets = [1, 0], sizes = [1, 128], strides = [1, 1]} : vector<3x128xf32> to vector<1x128xf32>
    %619 = vector.extract_strided_slice %601 {offsets = [2, 0], sizes = [1, 128], strides = [1, 1]} : vector<3x128xf32> to vector<1x128xf32>
    %620 = vector.extract_strided_slice %604 {offsets = [0, 0], sizes = [1, 128], strides = [1, 1]} : vector<3x128xf32> to vector<1x128xf32>
    %621 = vector.extract_strided_slice %604 {offsets = [1, 0], sizes = [1, 128], strides = [1, 1]} : vector<3x128xf32> to vector<1x128xf32>
    %622 = vector.extract_strided_slice %604 {offsets = [2, 0], sizes = [1, 128], strides = [1, 1]} : vector<3x128xf32> to vector<1x128xf32>
    %623 = vector.broadcast %605 : vector<1x128xf32> to vector<3x128xf32>
    %624 = arith.mulf %598, %623 : vector<3x128xf32>
    %625 = vector.broadcast %606 : vector<1x128xf32> to vector<3x128xf32>
    %626 = arith.mulf %601, %625 : vector<3x128xf32>
    %627 = arith.addf %624, %626 : vector<3x128xf32>
    %628 = vector.broadcast %607 : vector<1x128xf32> to vector<3x128xf32>
    %629 = arith.mulf %604, %628 : vector<3x128xf32>
    %630 = arith.addf %627, %629 : vector<3x128xf32>
    %631 = vector.broadcast %608 : vector<1x128xf32> to vector<3x128xf32>
    %632 = arith.mulf %598, %631 : vector<3x128xf32>
    %633 = vector.broadcast %609 : vector<1x128xf32> to vector<3x128xf32>
    %634 = arith.mulf %601, %633 : vector<3x128xf32>
    %635 = arith.addf %632, %634 : vector<3x128xf32>
    %636 = vector.broadcast %610 : vector<1x128xf32> to vector<3x128xf32>
    %637 = arith.mulf %604, %636 : vector<3x128xf32>
    %638 = arith.addf %635, %637 : vector<3x128xf32>
    %639 = vector.broadcast %611 : vector<1x128xf32> to vector<3x128xf32>
    %640 = arith.mulf %598, %639 : vector<3x128xf32>
    %641 = vector.broadcast %612 : vector<1x128xf32> to vector<3x128xf32>
    %642 = arith.mulf %601, %641 : vector<3x128xf32>
    %643 = arith.addf %640, %642 : vector<3x128xf32>
    %644 = vector.broadcast %613 : vector<1x128xf32> to vector<3x128xf32>
    %645 = arith.mulf %604, %644 : vector<3x128xf32>
    %646 = arith.addf %643, %645 : vector<3x128xf32>
    %647 = vector.broadcast %614 : vector<1x128xf32> to vector<3x128xf32>
    %648 = arith.mulf %598, %647 : vector<3x128xf32>
    %649 = vector.broadcast %615 : vector<1x128xf32> to vector<3x128xf32>
    %650 = arith.mulf %601, %649 : vector<3x128xf32>
    %651 = arith.addf %648, %650 : vector<3x128xf32>
    %652 = vector.broadcast %616 : vector<1x128xf32> to vector<3x128xf32>
    %653 = arith.mulf %604, %652 : vector<3x128xf32>
    %654 = arith.addf %651, %653 : vector<3x128xf32>
    %655 = vector.broadcast %617 : vector<1x128xf32> to vector<3x128xf32>
    %656 = arith.mulf %598, %655 : vector<3x128xf32>
    %657 = vector.broadcast %618 : vector<1x128xf32> to vector<3x128xf32>
    %658 = arith.mulf %601, %657 : vector<3x128xf32>
    %659 = arith.addf %656, %658 : vector<3x128xf32>
    %660 = vector.broadcast %619 : vector<1x128xf32> to vector<3x128xf32>
    %661 = arith.mulf %604, %660 : vector<3x128xf32>
    %662 = arith.addf %659, %661 : vector<3x128xf32>
    %663 = vector.broadcast %620 : vector<1x128xf32> to vector<3x128xf32>
    %664 = arith.mulf %598, %663 : vector<3x128xf32>
    %665 = vector.broadcast %621 : vector<1x128xf32> to vector<3x128xf32>
    %666 = arith.mulf %601, %665 : vector<3x128xf32>
    %667 = arith.addf %664, %666 : vector<3x128xf32>
    %668 = vector.broadcast %622 : vector<1x128xf32> to vector<3x128xf32>
    %669 = arith.mulf %604, %668 : vector<3x128xf32>
    %670 = arith.addf %667, %669 : vector<3x128xf32>
    %cst_77 = arith.constant 5.000000e-01 : f32
    %671 = vector.broadcast %cst_77 : f32 to vector<3x128xf32>
    %672 = arith.mulf %671, %598 : vector<3x128xf32>
    %673 = arith.addf %583, %672 : vector<3x128xf32>
    %cst_78 = arith.constant 5.000000e-01 : f32
    %674 = vector.broadcast %cst_78 : f32 to vector<3x128xf32>
    %675 = arith.mulf %674, %630 : vector<3x128xf32>
    %676 = arith.addf %673, %675 : vector<3x128xf32>
    %cst_79 = arith.constant 5.000000e-01 : f32
    %677 = vector.broadcast %cst_79 : f32 to vector<3x128xf32>
    %678 = arith.mulf %677, %601 : vector<3x128xf32>
    %679 = arith.addf %589, %678 : vector<3x128xf32>
    %cst_80 = arith.constant 5.000000e-01 : f32
    %680 = vector.broadcast %cst_80 : f32 to vector<3x128xf32>
    %681 = arith.mulf %680, %638 : vector<3x128xf32>
    %682 = arith.addf %679, %681 : vector<3x128xf32>
    %cst_81 = arith.constant 5.000000e-01 : f32
    %683 = vector.broadcast %cst_81 : f32 to vector<3x128xf32>
    %684 = arith.mulf %683, %604 : vector<3x128xf32>
    %685 = arith.addf %595, %684 : vector<3x128xf32>
    %cst_82 = arith.constant 5.000000e-01 : f32
    %686 = vector.broadcast %cst_82 : f32 to vector<3x128xf32>
    %687 = arith.mulf %686, %646 : vector<3x128xf32>
    %688 = arith.addf %685, %687 : vector<3x128xf32>
    %cst_83 = arith.constant 2.000000e+00 : f32
    %689 = vector.broadcast %cst_83 : f32 to vector<3x128xf32>
    %690 = arith.mulf %689, %598 : vector<3x128xf32>
    %691 = arith.addf %690, %654 : vector<3x128xf32>
    %cst_84 = arith.constant 2.000000e+00 : f32
    %692 = vector.broadcast %cst_84 : f32 to vector<3x128xf32>
    %693 = arith.mulf %692, %601 : vector<3x128xf32>
    %694 = arith.addf %693, %662 : vector<3x128xf32>
    %cst_85 = arith.constant 2.000000e+00 : f32
    %695 = vector.broadcast %cst_85 : f32 to vector<3x128xf32>
    %696 = arith.mulf %695, %604 : vector<3x128xf32>
    %697 = arith.addf %696, %670 : vector<3x128xf32>
    %698 = vector.extract_strided_slice %676 {offsets = [0, 0], sizes = [1, 128], strides = [1, 1]} : vector<3x128xf32> to vector<1x128xf32>
    %699 = vector.extract_strided_slice %676 {offsets = [1, 0], sizes = [1, 128], strides = [1, 1]} : vector<3x128xf32> to vector<1x128xf32>
    %700 = vector.extract_strided_slice %676 {offsets = [2, 0], sizes = [1, 128], strides = [1, 1]} : vector<3x128xf32> to vector<1x128xf32>
    %701 = vector.extract_strided_slice %682 {offsets = [0, 0], sizes = [1, 128], strides = [1, 1]} : vector<3x128xf32> to vector<1x128xf32>
    %702 = vector.extract_strided_slice %682 {offsets = [1, 0], sizes = [1, 128], strides = [1, 1]} : vector<3x128xf32> to vector<1x128xf32>
    %703 = vector.extract_strided_slice %682 {offsets = [2, 0], sizes = [1, 128], strides = [1, 1]} : vector<3x128xf32> to vector<1x128xf32>
    %704 = vector.extract_strided_slice %688 {offsets = [0, 0], sizes = [1, 128], strides = [1, 1]} : vector<3x128xf32> to vector<1x128xf32>
    %705 = vector.extract_strided_slice %688 {offsets = [1, 0], sizes = [1, 128], strides = [1, 1]} : vector<3x128xf32> to vector<1x128xf32>
    %706 = vector.extract_strided_slice %688 {offsets = [2, 0], sizes = [1, 128], strides = [1, 1]} : vector<3x128xf32> to vector<1x128xf32>
    %707 = vector.extract_strided_slice %691 {offsets = [0, 0], sizes = [1, 128], strides = [1, 1]} : vector<3x128xf32> to vector<1x128xf32>
    %708 = vector.extract_strided_slice %691 {offsets = [1, 0], sizes = [1, 128], strides = [1, 1]} : vector<3x128xf32> to vector<1x128xf32>
    %709 = vector.extract_strided_slice %691 {offsets = [2, 0], sizes = [1, 128], strides = [1, 1]} : vector<3x128xf32> to vector<1x128xf32>
    %710 = vector.extract_strided_slice %694 {offsets = [0, 0], sizes = [1, 128], strides = [1, 1]} : vector<3x128xf32> to vector<1x128xf32>
    %711 = vector.extract_strided_slice %694 {offsets = [1, 0], sizes = [1, 128], strides = [1, 1]} : vector<3x128xf32> to vector<1x128xf32>
    %712 = vector.extract_strided_slice %694 {offsets = [2, 0], sizes = [1, 128], strides = [1, 1]} : vector<3x128xf32> to vector<1x128xf32>
    %713 = vector.extract_strided_slice %697 {offsets = [0, 0], sizes = [1, 128], strides = [1, 1]} : vector<3x128xf32> to vector<1x128xf32>
    %714 = vector.extract_strided_slice %697 {offsets = [1, 0], sizes = [1, 128], strides = [1, 1]} : vector<3x128xf32> to vector<1x128xf32>
    %715 = vector.extract_strided_slice %697 {offsets = [2, 0], sizes = [1, 128], strides = [1, 1]} : vector<3x128xf32> to vector<1x128xf32>
    %716 = vector.broadcast %698 : vector<1x128xf32> to vector<3x128xf32>
    %717 = arith.mulf %691, %716 : vector<3x128xf32>
    %718 = vector.broadcast %699 : vector<1x128xf32> to vector<3x128xf32>
    %719 = arith.mulf %694, %718 : vector<3x128xf32>
    %720 = arith.addf %717, %719 : vector<3x128xf32>
    %721 = vector.broadcast %700 : vector<1x128xf32> to vector<3x128xf32>
    %722 = arith.mulf %697, %721 : vector<3x128xf32>
    %723 = arith.addf %720, %722 : vector<3x128xf32>
    %724 = vector.broadcast %701 : vector<1x128xf32> to vector<3x128xf32>
    %725 = arith.mulf %691, %724 : vector<3x128xf32>
    %726 = vector.broadcast %702 : vector<1x128xf32> to vector<3x128xf32>
    %727 = arith.mulf %694, %726 : vector<3x128xf32>
    %728 = arith.addf %725, %727 : vector<3x128xf32>
    %729 = vector.broadcast %703 : vector<1x128xf32> to vector<3x128xf32>
    %730 = arith.mulf %697, %729 : vector<3x128xf32>
    %731 = arith.addf %728, %730 : vector<3x128xf32>
    %732 = vector.broadcast %704 : vector<1x128xf32> to vector<3x128xf32>
    %733 = arith.mulf %691, %732 : vector<3x128xf32>
    %734 = vector.broadcast %705 : vector<1x128xf32> to vector<3x128xf32>
    %735 = arith.mulf %694, %734 : vector<3x128xf32>
    %736 = arith.addf %733, %735 : vector<3x128xf32>
    %737 = vector.broadcast %706 : vector<1x128xf32> to vector<3x128xf32>
    %738 = arith.mulf %697, %737 : vector<3x128xf32>
    %739 = arith.addf %736, %738 : vector<3x128xf32>
    %740 = vector.broadcast %707 : vector<1x128xf32> to vector<3x128xf32>
    %741 = arith.mulf %691, %740 : vector<3x128xf32>
    %742 = vector.broadcast %708 : vector<1x128xf32> to vector<3x128xf32>
    %743 = arith.mulf %694, %742 : vector<3x128xf32>
    %744 = arith.addf %741, %743 : vector<3x128xf32>
    %745 = vector.broadcast %709 : vector<1x128xf32> to vector<3x128xf32>
    %746 = arith.mulf %697, %745 : vector<3x128xf32>
    %747 = arith.addf %744, %746 : vector<3x128xf32>
    %748 = vector.broadcast %710 : vector<1x128xf32> to vector<3x128xf32>
    %749 = arith.mulf %691, %748 : vector<3x128xf32>
    %750 = vector.broadcast %711 : vector<1x128xf32> to vector<3x128xf32>
    %751 = arith.mulf %694, %750 : vector<3x128xf32>
    %752 = arith.addf %749, %751 : vector<3x128xf32>
    %753 = vector.broadcast %712 : vector<1x128xf32> to vector<3x128xf32>
    %754 = arith.mulf %697, %753 : vector<3x128xf32>
    %755 = arith.addf %752, %754 : vector<3x128xf32>
    %756 = vector.broadcast %713 : vector<1x128xf32> to vector<3x128xf32>
    %757 = arith.mulf %691, %756 : vector<3x128xf32>
    %758 = vector.broadcast %714 : vector<1x128xf32> to vector<3x128xf32>
    %759 = arith.mulf %694, %758 : vector<3x128xf32>
    %760 = arith.addf %757, %759 : vector<3x128xf32>
    %761 = vector.broadcast %715 : vector<1x128xf32> to vector<3x128xf32>
    %762 = arith.mulf %697, %761 : vector<3x128xf32>
    %763 = arith.addf %760, %762 : vector<3x128xf32>
    %cst_86 = arith.constant 5.000000e-01 : f32
    %764 = vector.broadcast %cst_86 : f32 to vector<3x128xf32>
    %765 = arith.mulf %764, %691 : vector<3x128xf32>
    %766 = arith.addf %676, %765 : vector<3x128xf32>
    %cst_87 = arith.constant 5.000000e-01 : f32
    %767 = vector.broadcast %cst_87 : f32 to vector<3x128xf32>
    %768 = arith.mulf %767, %723 : vector<3x128xf32>
    %769 = arith.addf %766, %768 : vector<3x128xf32>
    %cst_88 = arith.constant 5.000000e-01 : f32
    %770 = vector.broadcast %cst_88 : f32 to vector<3x128xf32>
    %771 = arith.mulf %770, %694 : vector<3x128xf32>
    %772 = arith.addf %682, %771 : vector<3x128xf32>
    %cst_89 = arith.constant 5.000000e-01 : f32
    %773 = vector.broadcast %cst_89 : f32 to vector<3x128xf32>
    %774 = arith.mulf %773, %731 : vector<3x128xf32>
    %775 = arith.addf %772, %774 : vector<3x128xf32>
    %cst_90 = arith.constant 5.000000e-01 : f32
    %776 = vector.broadcast %cst_90 : f32 to vector<3x128xf32>
    %777 = arith.mulf %776, %697 : vector<3x128xf32>
    %778 = arith.addf %688, %777 : vector<3x128xf32>
    %cst_91 = arith.constant 5.000000e-01 : f32
    %779 = vector.broadcast %cst_91 : f32 to vector<3x128xf32>
    %780 = arith.mulf %779, %739 : vector<3x128xf32>
    %781 = arith.addf %778, %780 : vector<3x128xf32>
    %cst_92 = arith.constant 2.000000e+00 : f32
    %782 = vector.broadcast %cst_92 : f32 to vector<3x128xf32>
    %783 = arith.mulf %782, %691 : vector<3x128xf32>
    %784 = arith.addf %783, %747 : vector<3x128xf32>
    %cst_93 = arith.constant 2.000000e+00 : f32
    %785 = vector.broadcast %cst_93 : f32 to vector<3x128xf32>
    %786 = arith.mulf %785, %694 : vector<3x128xf32>
    %787 = arith.addf %786, %755 : vector<3x128xf32>
    %cst_94 = arith.constant 2.000000e+00 : f32
    %788 = vector.broadcast %cst_94 : f32 to vector<3x128xf32>
    %789 = arith.mulf %788, %697 : vector<3x128xf32>
    %790 = arith.addf %789, %763 : vector<3x128xf32>
    %791 = vector.extract_strided_slice %769 {offsets = [0, 0], sizes = [1, 128], strides = [1, 1]} : vector<3x128xf32> to vector<1x128xf32>
    %792 = vector.extract_strided_slice %769 {offsets = [1, 0], sizes = [1, 128], strides = [1, 1]} : vector<3x128xf32> to vector<1x128xf32>
    %793 = vector.extract_strided_slice %769 {offsets = [2, 0], sizes = [1, 128], strides = [1, 1]} : vector<3x128xf32> to vector<1x128xf32>
    %794 = vector.extract_strided_slice %775 {offsets = [0, 0], sizes = [1, 128], strides = [1, 1]} : vector<3x128xf32> to vector<1x128xf32>
    %795 = vector.extract_strided_slice %775 {offsets = [1, 0], sizes = [1, 128], strides = [1, 1]} : vector<3x128xf32> to vector<1x128xf32>
    %796 = vector.extract_strided_slice %775 {offsets = [2, 0], sizes = [1, 128], strides = [1, 1]} : vector<3x128xf32> to vector<1x128xf32>
    %797 = vector.extract_strided_slice %781 {offsets = [0, 0], sizes = [1, 128], strides = [1, 1]} : vector<3x128xf32> to vector<1x128xf32>
    %798 = vector.extract_strided_slice %781 {offsets = [1, 0], sizes = [1, 128], strides = [1, 1]} : vector<3x128xf32> to vector<1x128xf32>
    %799 = vector.extract_strided_slice %781 {offsets = [2, 0], sizes = [1, 128], strides = [1, 1]} : vector<3x128xf32> to vector<1x128xf32>
    %800 = vector.extract_strided_slice %784 {offsets = [0, 0], sizes = [1, 128], strides = [1, 1]} : vector<3x128xf32> to vector<1x128xf32>
    %801 = vector.extract_strided_slice %784 {offsets = [1, 0], sizes = [1, 128], strides = [1, 1]} : vector<3x128xf32> to vector<1x128xf32>
    %802 = vector.extract_strided_slice %784 {offsets = [2, 0], sizes = [1, 128], strides = [1, 1]} : vector<3x128xf32> to vector<1x128xf32>
    %803 = vector.extract_strided_slice %787 {offsets = [0, 0], sizes = [1, 128], strides = [1, 1]} : vector<3x128xf32> to vector<1x128xf32>
    %804 = vector.extract_strided_slice %787 {offsets = [1, 0], sizes = [1, 128], strides = [1, 1]} : vector<3x128xf32> to vector<1x128xf32>
    %805 = vector.extract_strided_slice %787 {offsets = [2, 0], sizes = [1, 128], strides = [1, 1]} : vector<3x128xf32> to vector<1x128xf32>
    %806 = vector.extract_strided_slice %790 {offsets = [0, 0], sizes = [1, 128], strides = [1, 1]} : vector<3x128xf32> to vector<1x128xf32>
    %807 = vector.extract_strided_slice %790 {offsets = [1, 0], sizes = [1, 128], strides = [1, 1]} : vector<3x128xf32> to vector<1x128xf32>
    %808 = vector.extract_strided_slice %790 {offsets = [2, 0], sizes = [1, 128], strides = [1, 1]} : vector<3x128xf32> to vector<1x128xf32>
    %809 = vector.broadcast %791 : vector<1x128xf32> to vector<3x128xf32>
    %810 = arith.mulf %784, %809 : vector<3x128xf32>
    %811 = vector.broadcast %792 : vector<1x128xf32> to vector<3x128xf32>
    %812 = arith.mulf %787, %811 : vector<3x128xf32>
    %813 = arith.addf %810, %812 : vector<3x128xf32>
    %814 = vector.broadcast %793 : vector<1x128xf32> to vector<3x128xf32>
    %815 = arith.mulf %790, %814 : vector<3x128xf32>
    %816 = arith.addf %813, %815 : vector<3x128xf32>
    %817 = vector.broadcast %794 : vector<1x128xf32> to vector<3x128xf32>
    %818 = arith.mulf %784, %817 : vector<3x128xf32>
    %819 = vector.broadcast %795 : vector<1x128xf32> to vector<3x128xf32>
    %820 = arith.mulf %787, %819 : vector<3x128xf32>
    %821 = arith.addf %818, %820 : vector<3x128xf32>
    %822 = vector.broadcast %796 : vector<1x128xf32> to vector<3x128xf32>
    %823 = arith.mulf %790, %822 : vector<3x128xf32>
    %824 = arith.addf %821, %823 : vector<3x128xf32>
    %825 = vector.broadcast %797 : vector<1x128xf32> to vector<3x128xf32>
    %826 = arith.mulf %784, %825 : vector<3x128xf32>
    %827 = vector.broadcast %798 : vector<1x128xf32> to vector<3x128xf32>
    %828 = arith.mulf %787, %827 : vector<3x128xf32>
    %829 = arith.addf %826, %828 : vector<3x128xf32>
    %830 = vector.broadcast %799 : vector<1x128xf32> to vector<3x128xf32>
    %831 = arith.mulf %790, %830 : vector<3x128xf32>
    %832 = arith.addf %829, %831 : vector<3x128xf32>
    %833 = vector.broadcast %800 : vector<1x128xf32> to vector<3x128xf32>
    %834 = arith.mulf %784, %833 : vector<3x128xf32>
    %835 = vector.broadcast %801 : vector<1x128xf32> to vector<3x128xf32>
    %836 = arith.mulf %787, %835 : vector<3x128xf32>
    %837 = arith.addf %834, %836 : vector<3x128xf32>
    %838 = vector.broadcast %802 : vector<1x128xf32> to vector<3x128xf32>
    %839 = arith.mulf %790, %838 : vector<3x128xf32>
    %840 = arith.addf %837, %839 : vector<3x128xf32>
    %841 = vector.broadcast %803 : vector<1x128xf32> to vector<3x128xf32>
    %842 = arith.mulf %784, %841 : vector<3x128xf32>
    %843 = vector.broadcast %804 : vector<1x128xf32> to vector<3x128xf32>
    %844 = arith.mulf %787, %843 : vector<3x128xf32>
    %845 = arith.addf %842, %844 : vector<3x128xf32>
    %846 = vector.broadcast %805 : vector<1x128xf32> to vector<3x128xf32>
    %847 = arith.mulf %790, %846 : vector<3x128xf32>
    %848 = arith.addf %845, %847 : vector<3x128xf32>
    %849 = vector.broadcast %806 : vector<1x128xf32> to vector<3x128xf32>
    %850 = arith.mulf %784, %849 : vector<3x128xf32>
    %851 = vector.broadcast %807 : vector<1x128xf32> to vector<3x128xf32>
    %852 = arith.mulf %787, %851 : vector<3x128xf32>
    %853 = arith.addf %850, %852 : vector<3x128xf32>
    %854 = vector.broadcast %808 : vector<1x128xf32> to vector<3x128xf32>
    %855 = arith.mulf %790, %854 : vector<3x128xf32>
    %856 = arith.addf %853, %855 : vector<3x128xf32>
    %cst_95 = arith.constant 5.000000e-01 : f32
    %857 = vector.broadcast %cst_95 : f32 to vector<3x128xf32>
    %858 = arith.mulf %857, %784 : vector<3x128xf32>
    %859 = arith.addf %769, %858 : vector<3x128xf32>
    %cst_96 = arith.constant 5.000000e-01 : f32
    %860 = vector.broadcast %cst_96 : f32 to vector<3x128xf32>
    %861 = arith.mulf %860, %816 : vector<3x128xf32>
    %862 = arith.addf %859, %861 : vector<3x128xf32>
    %cst_97 = arith.constant 5.000000e-01 : f32
    %863 = vector.broadcast %cst_97 : f32 to vector<3x128xf32>
    %864 = arith.mulf %863, %787 : vector<3x128xf32>
    %865 = arith.addf %775, %864 : vector<3x128xf32>
    %cst_98 = arith.constant 5.000000e-01 : f32
    %866 = vector.broadcast %cst_98 : f32 to vector<3x128xf32>
    %867 = arith.mulf %866, %824 : vector<3x128xf32>
    %868 = arith.addf %865, %867 : vector<3x128xf32>
    %cst_99 = arith.constant 5.000000e-01 : f32
    %869 = vector.broadcast %cst_99 : f32 to vector<3x128xf32>
    %870 = arith.mulf %869, %790 : vector<3x128xf32>
    %871 = arith.addf %781, %870 : vector<3x128xf32>
    %cst_100 = arith.constant 5.000000e-01 : f32
    %872 = vector.broadcast %cst_100 : f32 to vector<3x128xf32>
    %873 = arith.mulf %872, %832 : vector<3x128xf32>
    %874 = arith.addf %871, %873 : vector<3x128xf32>
    %cst_101 = arith.constant 2.000000e+00 : f32
    %875 = vector.broadcast %cst_101 : f32 to vector<3x128xf32>
    %876 = arith.mulf %875, %784 : vector<3x128xf32>
    %877 = arith.addf %876, %840 : vector<3x128xf32>
    %cst_102 = arith.constant 2.000000e+00 : f32
    %878 = vector.broadcast %cst_102 : f32 to vector<3x128xf32>
    %879 = arith.mulf %878, %787 : vector<3x128xf32>
    %880 = arith.addf %879, %848 : vector<3x128xf32>
    %cst_103 = arith.constant 2.000000e+00 : f32
    %881 = vector.broadcast %cst_103 : f32 to vector<3x128xf32>
    %882 = arith.mulf %881, %790 : vector<3x128xf32>
    %883 = arith.addf %882, %856 : vector<3x128xf32>
    %c0_104 = arith.constant 0 : index
    %c0_105 = arith.constant 0 : index
    %884 = vector.load %arg2[%c0_104, %c0_105] : memref<3x128xf32, #tpu.memory_space<vmem>>, vector<3x128xf32>
    %885 = vector.broadcast %2 : vector<3x1xf32> to vector<3x128xf32>
    %886 = vector.broadcast %0 : vector<1x128xf32> to vector<3x128xf32>
    %887 = arith.mulf %885, %886 : vector<3x128xf32>
    %888 = arith.addf %884, %887 : vector<3x128xf32>
    %889 = vector.extract_strided_slice %884 {offsets = [0, 0], sizes = [1, 128], strides = [1, 1]} : vector<3x128xf32> to vector<1x128xf32>
    %890 = vector.broadcast %889 : vector<1x128xf32> to vector<3x128xf32>
    %891 = arith.mulf %877, %890 : vector<3x128xf32>
    %892 = arith.addf %888, %891 : vector<3x128xf32>
    %893 = vector.extract_strided_slice %887 {offsets = [0, 0], sizes = [1, 128], strides = [1, 1]} : vector<3x128xf32> to vector<1x128xf32>
    %894 = vector.broadcast %893 : vector<1x128xf32> to vector<3x128xf32>
    %895 = arith.mulf %862, %894 : vector<3x128xf32>
    %896 = arith.addf %892, %895 : vector<3x128xf32>
    %897 = vector.extract_strided_slice %884 {offsets = [1, 0], sizes = [1, 128], strides = [1, 1]} : vector<3x128xf32> to vector<1x128xf32>
    %898 = vector.broadcast %897 : vector<1x128xf32> to vector<3x128xf32>
    %899 = arith.mulf %880, %898 : vector<3x128xf32>
    %900 = arith.addf %896, %899 : vector<3x128xf32>
    %901 = vector.extract_strided_slice %887 {offsets = [1, 0], sizes = [1, 128], strides = [1, 1]} : vector<3x128xf32> to vector<1x128xf32>
    %902 = vector.broadcast %901 : vector<1x128xf32> to vector<3x128xf32>
    %903 = arith.mulf %868, %902 : vector<3x128xf32>
    %904 = arith.addf %900, %903 : vector<3x128xf32>
    %905 = vector.extract_strided_slice %884 {offsets = [2, 0], sizes = [1, 128], strides = [1, 1]} : vector<3x128xf32> to vector<1x128xf32>
    %906 = vector.broadcast %905 : vector<1x128xf32> to vector<3x128xf32>
    %907 = arith.mulf %883, %906 : vector<3x128xf32>
    %908 = arith.addf %904, %907 : vector<3x128xf32>
    %909 = vector.extract_strided_slice %887 {offsets = [2, 0], sizes = [1, 128], strides = [1, 1]} : vector<3x128xf32> to vector<1x128xf32>
    %910 = vector.broadcast %909 : vector<1x128xf32> to vector<3x128xf32>
    %911 = arith.mulf %874, %910 : vector<3x128xf32>
    %912 = arith.addf %908, %911 : vector<3x128xf32>
    %c0_106 = arith.constant 0 : index
    %c0_107 = arith.constant 0 : index
    %913 = vector.load %arg5[%c0_106, %c0_107] : memref<3x128xf32, #tpu.memory_space<vmem>>, vector<3x128xf32>
    tpu.vector_store %arg5[%c0_106, %c0_107], %912 {strides = array<i32>} : memref<3x128xf32, #tpu.memory_space<vmem>>, vector<3x128xf32>,
    return
  }
  func.func @transform_0(%arg0: i32) -> (i32, i32) {
    %c0_i32 = arith.constant 0 : i32
    %c0_i32_0 = arith.constant 0 : i32
    return %c0_i32, %arg0 : i32, i32
  }
  func.func @transform_1(%arg0: i32) -> (i32, i32) {
    %c0_i32 = arith.constant 0 : i32
    %c0_i32_0 = arith.constant 0 : i32
    return %c0_i32, %arg0 : i32, i32
  }
  func.func @transform_2(%arg0: i32) -> (i32, i32) {
    %c0_i32 = arith.constant 0 : i32
    %c0_i32_0 = arith.constant 0 : i32
    %c0_i32_1 = arith.constant 0 : i32
    return %c0_i32, %c0_i32_0 : i32, i32
  }
  func.func @transform_3(%arg0: i32) -> (i32, i32) {
    %c0_i32 = arith.constant 0 : i32
    %c0_i32_0 = arith.constant 0 : i32
    %c0_i32_1 = arith.constant 0 : i32
    return %c0_i32, %c0_i32_0 : i32, i32
  }
  func.func @transform_4(%arg0: i32) -> (i32, i32) {
    %c0_i32 = arith.constant 0 : i32
    %c0_i32_0 = arith.constant 0 : i32
    return %c0_i32, %arg0 : i32, i32
  }
}

</mosaic_0001>

<bundles_post_ra>
// kernel: tpu_custom_call.1
= control target key start
LH: loop header
LB: loop body
LE: loop exit
PB: predicated region body
PF: predicated region fallthrough
CT: control target
= control target key end

     0   :  { %s1636_s0 = inlined_call_operand.hbm [shape: f32[1,256], index: 0, kind: input, shape index: {}]   ;;  %s1637_s1 = inlined_call_operand.hbm [shape: f32[3,256], index: 1, kind: input, shape index: {}]   ;;  %s1638_s2 = inlined_call_operand.vmem [shape: f32[3,3], index: 2, kind: input, shape index: {}]   ;;  %s1639_s3 = inlined_call_operand.vmem [shape: f32[3,1], index: 3, kind: input, shape index: {}]   ;;  %s1640_s4 = inlined_call_operand.hbm [shape: f32[3,256], index: 4, kind: output, shape index: {}]  }
   0x1   :  { %1641 = sst [smem:[#allocation11_spill]] %s1636_s0 }
   0x2   :  { %9 = vsyncpa [#allocation3], 0 }
   0x3   :  { %11 = vsyncpa [#allocation3 + $0x1], 0 }
   0x4   :  { %12 = vsyncpa [#allocation6], 0 }
   0x5   :  { %14 = vsyncpa [#allocation6 + $0x1], 0 }
   0x6   :  { %15 = vsyncpa [#allocation4], 0 }
   0x7   :  { %17 = vsyncpa [#allocation4 + $0x1], 0  ;;  %s1237_s15 = smov 0   ;;  %s1239_s16 = smov 0  }
   0x8   :  { %s1241_s17 = smov 0   ;;  %s1243_s18 = smov 0  }
   0x9 LB: > { %s1258_s19 = sadd.s32 4294967295, %s1207_s18   ;;  %s1005_s20 = sadd.s32 4294967294, %s1207_s18   ;;  %s1207_s18 = sphi %s1243_s18, %s1653_s18   ;;  %s1203_s17 = sphi %s1241_s17, %s1652_s17   ;;  %s1199_s16 = sphi %s1239_s16, %s1651_s16   ;;  %s1195_s15 = sphi %s1237_s15, %s1650_s15  }
   0xa   : > { %s1262_s21 = sadd.s32 1, %s1207_s18   ;;  %s30_s22 = sadd.s32 1, %s1203_s17 }
   0xb   : > { %s27_s23 = ssub.s32 %s1207_s18, %s1262_s21  ;;  %p37_p0 = scmp.ne.s32.totalorder %s1203_s17, %s1199_s16 }
   0xc   : > { %p28_p1 = scmp.eq.s32.totalorder %s27_s23, 0  ;;  %p38_p2 = scmp.eq.s32.totalorder %s1207_s18, 0 }
   0xd   : > { %p43_p3 = scmp.ne.s32.totalorder %s1199_s16, %s1195_s15  ;;  %p44_p4 = scmp.eq.s32.totalorder %s1258_s19, 0 }
   0xe   : > { %s1274_s24 = scalar_select %p28_p1, %s1203_s17, %s30_s22  }
   0xf   : > { %p1276_p5 = por %p38_p2, %p37_p0  ;;  %p1280_p6 = por %p44_p4, %p43_p3 }
  0x10   : > { %p135_p7 = scmp.eq.s32.totalorder %s1258_s19, 1  ;;  %p141_p8 = scmp.eq.s32.totalorder %s1005_s20, 1 }
  0x11   : > { %p1034_p10 = scmp.lt.s32.totalorder %s1207_s18, 2  ;;  %s1296_s29 = sand.u32 1, %s1203_s17  }
  0x12   : > { %p1287_p11 = por %p135_p7, %p37_p0  ;;  %p1291_p12 = por %p141_p8, %p43_p3 }
  0x13   : > { %s1646_s0 = sld [smem:[#allocation11_spill]]  ;;  %s170_s8 = scalar_lea.vmem [#allocation2], %s1296_s29 }
  0x14   : > { %s177_s9 = sshll.u32 %s170_s8, 4  ;;  %p1305_p13 = pnand %p1034_p10, %p1276_p5  ;;  %s178_s9 = int_to_ptr.vmem [resolvable:$true] %s177_s9 }
  0x15   : > { %p1010_p0 = scmp.ge.s32.totalorder %s1207_s18, 1  ;;  %p201_p1 = scmp.lt.s32.totalorder %s1207_s18, 3 }
  0x16   : > { %s1008_s11 = sshll.u32 %s1296_s29, 2  ;;  %s168_s12 = scalar_lea.sflag [#allocation3], %s1296_s29 }
  0x17   : > { %p1081_p3 = pneg %p1305_p13 }
  0x19   : > { %s173_s6 = scalar_lea.hbm %s1646_s0, %s1207_s18  ;;  %s1084_s23 = scalar_lea.hbm %s1646_s0, 2 }
  0x1a   : > { %s175_s7 = sshll.u32 %s173_s6, 4  ;;  %s176_s7 = int_to_ptr.hbm [resolvable:$true] %s175_s7 }
  0x1b   : > { %s1077_s13 = sshra.s32 %s176_s7, 4  ;;  %s1078_s13 = int_to_ptr.hbm [resolvable:$true] %s1077_s13 }
  0x1c   : > { %s1079_s14 = scalar_lea.hbm %s1078_s13, 1  ;;  %p1085_p5 = scmp.lt.s32.totalorder %s1078_s13, %s1646_s0 }
  0x1d   : > { %p1080_p2 = scmp.ne.s32.totalorder %s1078_s13, %s1079_s14  ;;  %p1086_p8 = scmp.lt.s32.totalorder %s1084_s23, %s1079_s14 }
  0x1f   : > { %p1082_p4 = pnand %p1081_p3, %p1080_p2  ;;  %p1087_p10 = por %p1086_p8, %p1085_p5 }
  0x21   : > { %p1083_p7 = pneg %p1082_p4 }
  0x23   : > { %p1088_p9 = pnand %p1087_p10, %p1083_p7 }
  0x25   : > { %1091 = shalt.err (!%p1088_p9)
}
  0x26   : > { %1026 = dma.hbm_to_vmem [thread:$0]  (!%p1305_p13), %s176_s7, 16, %s178_s9, %s168_s12  }
  0x27   : > { %p1330_p2 = pnand %p1010_p0, %p201_p1  ;;  %s1009_s6 = sshll.u32 %s1207_s18, 2 }
  0x28   : > { %s188_s8 = scalar_lea.vmem [#allocation5], %s1008_s11  ;;  %s192_s22 = scalar_lea.hbm %s1637_s1, %s1009_s6 }
  0x29   : > { %s196_s13 = sshll.u32 %s188_s8, 4  ;;  %s194_s23 = sshll.u32 %s192_s22, 4  ;;  %s197_s13 = int_to_ptr.vmem [resolvable:$true] %s196_s13  ;;  %s195_s23 = int_to_ptr.hbm [resolvable:$true] %s194_s23 }
  0x2a   : > { %s185_s25 = scalar_lea.sflag [#allocation6], %s1296_s29  ;;  %s1107_s30 = sshra.s32 %s195_s23, 4  ;;  %s1108_s30 = int_to_ptr.hbm [resolvable:$true] %s1107_s30 }
  0x2b   : > { %s1109_s7 = scalar_lea.hbm %s1108_s30, 4  ;;  %s1114_s11 = scalar_lea.hbm %s1637_s1, 8 }
  0x2c   : > { %p1110_p9 = scmp.ne.s32.totalorder %s1108_s30, %s1109_s7  ;;  %p1115_p4 = scmp.lt.s32.totalorder %s1108_s30, %s1637_s1 }
  0x2d   : > { %p1116_p7 = scmp.lt.s32.totalorder %s1114_s11, %s1109_s7 }
  0x2e   : > { %p1112_p0 = pnand %p1110_p9, %p1081_p3 }
  0x2f   : > { %p1117_p5 = por %p1116_p7, %p1115_p4 }
  0x30   : > { %p1113_p1 = pneg %p1112_p0 }
  0x32   : > { %p1118_p8 = pnand %p1117_p5, %p1113_p1 }
  0x34   : > { %1121 = shalt.err (!%p1118_p8)
}
  0x35   : > { %1029 = dma.hbm_to_vmem [thread:$0]  (!%p1305_p13), %s195_s23, 64, %s197_s13, %s185_s25  }
  0x36   : > { %205 = sbr.rel (%p1330_p2) target bundleno = 358 (0x166), region = 36  ;;  %s1353_s29 = sand.u32 (!%p1330_p2), 1, %s1199_s16  }
  0x37   : > { %s208_s6 = scalar_lea.sflag (!%p1330_p2), [#allocation3], %s1353_s29  ;;  %s210_s14 = scalar_lea.vmem (!%p1330_p2), [#allocation2], %s1353_s29 }
  0x3b   : > { %1182 = dma.done.wait (%p1280_p6), %s208_s6, 16  }
  0x3c   : > { %1184 = vsyncadd (%p1280_p6), %s208_s6, 4294967280  ;;  %s1011_s0 = sshll.u32 %s1353_s29, 2  ;;  %s217_s10 = scalar_lea.sflag [#allocation6], %s1353_s29 }
  0x3d   : > { %s1365_s5 = scalar_lea.vmem [#allocation5], %s1011_s0 }
  0x3e   : > { %1186 = dma.done.wait (%p1280_p6), %s217_s10, 64  }
  0x3f   : > { %1188 = vsyncadd (%p1280_p6), %s217_s10, 4294967232  ;;  %v1209_v0 = vmov 2   ;;  %v1210_v1 = vmov 0   ;;  %v251_v2 = vld [vmem:[%s1638_s2] sm:$0x7]  ;;  %v1211_v3 = vmov 1  }
  0x40   : > { %1073 = vset.pattern.permute.xlu1 %v1209_v0  ;;  %1071 = vset.pattern.permute.xlu0 %v1210_v1  ;;  %v252_v4 = vld [vmem:[%s1639_s3] sm:$0x7]  ;;  %s1014_s26 = sshll.u32 %s1258_s19, 2  ;;  %s249_s9 = scalar_lea.vmem [#allocation7], %s1011_s0 }
  0x41   : > { %269 = vperm.xlu1 %1073, %v251_v2   ;;  %256 = vperm.xlu0 %1071, %v251_v2   ;;  %v250_v5 = vld [vmem:[%s210_s14] sm:$0x1]  ;;  %s911_s7 = scalar_lea.hbm %s1640_s4, %s1014_s26  ;;  %s913_s12 = sshll.u32 %s249_s9, 4  ;;  %s914_s12 = int_to_ptr.vmem [resolvable:$true] %s913_s12 }
  0x42   : > { %v253_v6 = vmul.f32 0.015625, %v250_v5  ;;  %s915_s19 = sshll.u32 %s911_s7, 4  ;;  %s901_s11 = scalar_lea.sflag [#allocation4], %s1353_s29  ;;  %s916_s19 = int_to_ptr.hbm [resolvable:$true] %s915_s19 }
  0x43   : > { %s1151_s8 = sshra.s32 %s916_s19, 4  ;;  %s1157_s0 = scalar_lea.hbm %s1640_s4, 8  ;;  %s1152_s8 = int_to_ptr.hbm [resolvable:$true] %s1151_s8 }
  0x44   : > { %v260_v7 = vperm.slane %v253_v6, 0  ;;  %s1153_s6 = scalar_lea.hbm %s1152_s8, 4  ;;  %p1158_p10 = scmp.lt.s32.totalorder %s1152_s8, %s1640_s4 }
  0x45   : > { %p1154_p6 = scmp.ne.s32.totalorder %s1152_s8, %s1153_s6  ;;  %p1159_p2 = scmp.lt.s32.totalorder %s1157_s0, %s1153_s6 }
  0x47   : > { %p1155_p13 = pnand %p1154_p6, %p1287_p11  ;;  %p1160_p9 = por %p1159_p2, %p1158_p10 }
  0x49   : > { %1072 = vset.pattern.permute.xlu0 %v1211_v3  ;;  %1074 = vset.pattern.permute.xlu1 %v1210_v1  ;;  %p1156_p3 = pneg %p1155_p13 }
  0x4a   : > { %264 = vperm.xlu0 %1072, %v251_v2   ;;  %873 = vperm.xlu1 %1074, %v252_v4  }
  0x4b   : > { %p1161_p0 = pnand %p1160_p9, %p1156_p3 }
  0x52   : > { %1075 = vset.pattern.permute.xlu0 %v1210_v1 }
  0xb3   : > { %v257_v8 = vpop.permute.xlu0 %256  ;;  %v270_v9 = vpop.permute.xlu1 %269 }
  0xb4   : > { %v1379_v10 = vmul.f32 %v260_v7, %v257_v8  ;;  %v1381_v11 = vmul.f32 %v270_v9, %v260_v7 }
  0xb6   : > { %v1384_v12 = vperm.slane %v1379_v10, 0  ;;  %v1387_v13 = vperm.slane %v1381_v11, 0  ;;  %v1390_v14 = vperm.slane %v1381_v11, 1  ;;  %v1393_v16 = vperm.slane %v1381_v11, 2 }
  0xb7   : > { %v1396_v17 = vperm.slane %v1379_v10, 1  ;;  %v1401_v19 = vperm.slane %v1379_v10, 2  ;;  %v275_v1 = vmul.f32 0.5, %v1381_v11  ;;  %v273_v5 = vmul.f32 0.5, %v1379_v10 }
  0xb8   : > { %v277_v20 = vmul.f32 %v1384_v12, %v1379_v10  ;;  %v293_v24 = vmul.f32 %v1387_v13, %v1379_v10  ;;  %v298_v27 = vmul.f32 %v1393_v16, %v1381_v11 }
  0xb9   : > { %v282_v31 = vmul.f32 %v1401_v19, %v1381_v11 }
  0xbc   : > { %v265_v15 = vpop.permute.xlu0 %264 }
  0xbd   : > { %v1398_v18 = vmul.f32 %v265_v15, %v260_v7 }
  0xbf   : > { %v279_v21 = vmul.f32 %v1396_v17, %v1398_v18  ;;  %v1408_v22 = vperm.slane %v1398_v18, 0  ;;  %v1411_v23 = vperm.slane %v1398_v18, 1  ;;  %v1416_v25 = vperm.slane %v1398_v18, 2 }
  0xc0   : > { %v295_v26 = vmul.f32 %v1390_v14, %v1398_v18  ;;  %v274_v9 = vmul.f32 0.5, %v1398_v18 }
  0xc1   : > { %v280_v28 = vadd.f32 %v279_v21, %v277_v20  ;;  %v285_v29 = vmul.f32 %v1408_v22, %v1379_v10  ;;  %v287_v30 = vmul.f32 %v1411_v23, %v1398_v18  ;;  %v290_v34 = vmul.f32 %v1416_v25, %v1381_v11 }
  0xc2   : > { %v296_v32 = vadd.f32 %v295_v26, %v293_v24 }
  0xc3   : > { %v288_v33 = vadd.f32 %v287_v30, %v285_v29  ;;  %v283_v35 = vadd.f32 %v282_v31, %v280_v28 }
  0xc4   : > { %v299_v37 = vadd.f32 %v298_v27, %v296_v32 }
  0xc5   : > { %v291_v36 = vadd.f32 %v290_v34, %v288_v33  ;;  %v312_v38 = vmul.f32 %v283_v35, %v1384_v12  ;;  %v317_v40 = vmul.f32 %v1408_v22, %v283_v35  ;;  %v322_v46 = vmul.f32 %v1387_v13, %v283_v35 }
  0xc6   : > { %v315_v42 = vmul.f32 %v299_v37, %v1401_v19  ;;  %v320_v43 = vmul.f32 %v299_v37, %v1416_v25  ;;  %v325_v51 = vmul.f32 %v299_v37, %v1393_v16  ;;  %v300_v62 = vmul.f32 0.5, %v283_v35 }
  0xc7   : > { %v313_v39 = vmul.f32 %v291_v36, %v1396_v17  ;;  %v318_v41 = vmul.f32 %v291_v36, %v1411_v23  ;;  %v323_v47 = vmul.f32 %v1390_v14, %v291_v36  ;;  %v306_v2 = vmul.f32 0.16666667, %v283_v35 }
  0xc8   : > { %v304_v15 = vmul.f32 0.5, %v299_v37  ;;  %v310_v20 = vmul.f32 0.16666667, %v299_v37  ;;  %v301_v24 = vadd.f32 %v300_v62, %v1379_v10  ;;  %v302_v26 = vmul.f32 0.5, %v291_v36 }
  0xc9   : > { %v314_v44 = vadd.f32 %v313_v39, %v312_v38  ;;  %v319_v45 = vadd.f32 %v318_v41, %v317_v40  ;;  %v324_v50 = vadd.f32 %v323_v47, %v322_v46  ;;  %v307_v29 = vadd.f32 %v306_v2, %v273_v5 }
  0xca   : > { %v308_v30 = vmul.f32 0.16666667, %v291_v36  ;;  %v305_v37 = vadd.f32 %v304_v15, %v1381_v11  ;;  %v311_v39 = vadd.f32 %v310_v20, %v275_v1  ;;  %v303_v36 = vadd.f32 %v302_v26, %v1398_v18 }
  0xcb   : > { %v316_v48 = vadd.f32 %v315_v42, %v314_v44  ;;  %v321_v49 = vadd.f32 %v320_v43, %v319_v45  ;;  %v326_v52 = vadd.f32 %v325_v51, %v324_v50 }
  0xcc   : > { %v309_v45 = vadd.f32 %v308_v30, %v274_v9 }
  0xcd   : > { %v339_v53 = vmul.f32 %v316_v48, %v1384_v12  ;;  %v340_v54 = vmul.f32 %v321_v49, %v1396_v17  ;;  %v344_v55 = vmul.f32 %v316_v48, %v1408_v22  ;;  %v342_v57 = vmul.f32 %v326_v52, %v1401_v19 }
  0xce   : > { %v345_v58 = vmul.f32 %v321_v49, %v1411_v23  ;;  %v349_v59 = vmul.f32 %v316_v48, %v1387_v13  ;;  %v350_v61 = vmul.f32 %v321_v49, %v1390_v14  ;;  %v347_v0 = vmul.f32 %v326_v52, %v1416_v25 }
  0xcf   : > { %v341_v56 = vadd.f32 %v340_v54, %v339_v53  ;;  %v352_v4 = vmul.f32 %v326_v52, %v1393_v16  ;;  %v327_v31 = vmul.f32 0.16666667, %v316_v48  ;;  %v329_v10 = vmul.f32 0.16666667, %v321_v49 }
  0xd0   : > { %v346_v63 = vadd.f32 %v345_v58, %v344_v55  ;;  %v351_v3 = vadd.f32 %v350_v61, %v349_v59  ;;  %v333_v41 = vmul.f32 0.041666668, %v316_v48  ;;  %v335_v42 = vmul.f32 0.041666668, %v321_v49 }
  0xd1   : > { %v343_v60 = vadd.f32 %v342_v57, %v341_v56  ;;  %v328_v50 = vadd.f32 %v327_v31, %v301_v24  ;;  %v331_v51 = vmul.f32 0.16666667, %v326_v52  ;;  %v337_v53 = vmul.f32 0.041666668, %v326_v52 }
  0xd2   : > { %v348_v6 = vadd.f32 %v347_v0, %v346_v63  ;;  %v353_v21 = vadd.f32 %v352_v4, %v351_v3  ;;  %v330_v49 = vadd.f32 %v329_v10, %v303_v36  ;;  %v334_v57 = vadd.f32 %v333_v41, %v307_v29 }
  0xd3   : > { %v366_v7 = vmul.f32 %v343_v60, %v1384_v12  ;;  %v371_v8 = vmul.f32 %v343_v60, %v1408_v22  ;;  %v376_v32 = vmul.f32 %v343_v60, %v1387_v13  ;;  %v354_v11 = vmul.f32 0.041666668, %v343_v60 }
  0xd4   : > { %v367_v27 = vmul.f32 %v348_v6, %v1396_v17  ;;  %v372_v28 = vmul.f32 %v348_v6, %v1411_v23  ;;  %v369_v34 = vmul.f32 %v353_v21, %v1401_v19  ;;  %v374_v38 = vmul.f32 %v353_v21, %v1416_v25 }
  0xd5   : > { %v377_v40 = vmul.f32 %v348_v6, %v1390_v14  ;;  %v379_v47 = vmul.f32 %v353_v21, %v1393_v16  ;;  %v336_v58 = vadd.f32 %v335_v42, %v309_v45  ;;  %v356_v59 = vmul.f32 0.041666668, %v348_v6 }
  0xd6   : > { %v368_v33 = vadd.f32 %v367_v27, %v366_v7  ;;  %v373_v35 = vadd.f32 %v372_v28, %v371_v8  ;;  %v360_v61 = vmul.f32 0.008333334, %v343_v60  ;;  %v362_v62 = vmul.f32 0.008333334, %v348_v6 }
  0xd7   : > { %v378_v46 = vadd.f32 %v377_v40, %v376_v32  ;;  %v332_v3 = vadd.f32 %v331_v51, %v305_v37  ;;  %v338_v4 = vadd.f32 %v337_v53, %v311_v39  ;;  %v355_v5 = vadd.f32 %v354_v11, %v328_v50 }
  0xd8   : > { %v370_v43 = vadd.f32 %v369_v34, %v368_v33  ;;  %v375_v44 = vadd.f32 %v374_v38, %v373_v35  ;;  %v358_v8 = vmul.f32 0.041666668, %v353_v21  ;;  %v364_v9 = vmul.f32 0.008333334, %v353_v21 }
  0xd9   : > { %v380_v55 = vadd.f32 %v379_v47, %v378_v46  ;;  %v357_v24 = vadd.f32 %v356_v59, %v330_v49  ;;  %v361_v60 = vadd.f32 %v360_v61, %v334_v57  ;;  %v363_v27 = vadd.f32 %v362_v62, %v336_v58 }
  0xda   : > { %v393_v54 = vmul.f32 %v370_v43, %v1384_v12  ;;  %v394_v56 = vmul.f32 %v375_v44, %v1396_v17  ;;  %v398_v48 = vmul.f32 %v370_v43, %v1408_v22  ;;  %v399_v18 = vmul.f32 %v375_v44, %v1411_v23 }
  0xdb   : > { %v396_v0 = vmul.f32 %v380_v55, %v1401_v19  ;;  %v401_v1 = vmul.f32 %v380_v55, %v1416_v25  ;;  %v403_v2 = vmul.f32 %v370_v43, %v1387_v13  ;;  %v404_v7 = vmul.f32 %v375_v44, %v1390_v14 }
  0xdc   : > { %v395_v63 = vadd.f32 %v394_v56, %v393_v54  ;;  %v400_v52 = vadd.f32 %v399_v18, %v398_v48  ;;  %v406_v26 = vmul.f32 %v380_v55, %v1393_v16  ;;  %v381_v28 = vmul.f32 0.008333334, %v370_v43 }
  0xdd   : > { %v405_v6 = vadd.f32 %v404_v7, %v403_v2  ;;  %v383_v29 = vmul.f32 0.008333334, %v375_v44  ;;  %v387_v31 = vmul.f32 0.0013888889, %v370_v43  ;;  %v359_v35 = vadd.f32 %v358_v8, %v332_v3 }
  0xde   : > { %v397_v15 = vadd.f32 %v396_v0, %v395_v63  ;;  %v402_v20 = vadd.f32 %v401_v1, %v400_v52  ;;  %v365_v21 = vadd.f32 %v364_v9, %v338_v4  ;;  %v389_v38 = vmul.f32 0.0013888889, %v375_v44 }
  0xdf   : > { %v407_v32 = vadd.f32 %v406_v26, %v405_v6  ;;  %v385_v39 = vmul.f32 0.008333334, %v380_v55  ;;  %v391_v10 = vmul.f32 0.0013888889, %v380_v55  ;;  %v382_v46 = vadd.f32 %v381_v28, %v355_v5 }
  0xe0   : > { %v420_v30 = vmul.f32 %v397_v15, %v1384_v12  ;;  %v421_v33 = vmul.f32 %v402_v20, %v1396_v17  ;;  %v425_v34 = vmul.f32 %v397_v15, %v1408_v22  ;;  %v426_v37 = vmul.f32 %v402_v20, %v1411_v23 }
  0xe1   : > { %v408_v40 = vmul.f32 0.0013888889, %v397_v15  ;;  %v423_v42 = vmul.f32 %v407_v32, %v1401_v19  ;;  %v428_v45 = vmul.f32 %v407_v32, %v1416_v25  ;;  %v430_v43 = vmul.f32 %v397_v15, %v1387_v13 }
  0xe2   : > { %v422_v41 = vadd.f32 %v421_v33, %v420_v30  ;;  %v427_v36 = vadd.f32 %v426_v37, %v425_v34  ;;  %v384_v47 = vadd.f32 %v383_v29, %v357_v24  ;;  %v388_v50 = vadd.f32 %v387_v31, %v361_v60 }
  0xe3   : > { %v431_v51 = vmul.f32 %v402_v20, %v1390_v14  ;;  %v410_v53 = vmul.f32 0.0013888889, %v402_v20  ;;  %v414_v44 = vmul.f32 0.0001984127, %v397_v15  ;;  %v390_v56 = vadd.f32 %v389_v38, %v363_v27 }
  0xe4   : > { %v424_v54 = vadd.f32 %v423_v42, %v422_v41  ;;  %v429_v11 = vadd.f32 %v428_v45, %v427_v36  ;;  %v416_v55 = vmul.f32 0.0001984127, %v402_v20  ;;  %v433_v49 = vmul.f32 %v407_v32, %v1393_v16 }
  0xe5   : > { %v432_v48 = vadd.f32 %v431_v51, %v430_v43  ;;  %v386_v57 = vadd.f32 %v385_v39, %v359_v35  ;;  %v392_v58 = vadd.f32 %v391_v10, %v365_v21  ;;  %v409_v18 = vadd.f32 %v408_v40, %v382_v46 }
  0xe6   : > { %v447_v59 = vmul.f32 %v424_v54, %v1384_v12  ;;  %v412_v61 = vmul.f32 0.0013888889, %v407_v32  ;;  %v448_v63 = vmul.f32 %v429_v11, %v1396_v17  ;;  %v452_v0 = vmul.f32 %v424_v54, %v1408_v22 }
  0xe7   : > { %v434_v62 = vadd.f32 %v433_v49, %v432_v48  ;;  %v411_v52 = vadd.f32 %v410_v53, %v384_v47  ;;  %v415_v1 = vadd.f32 %v414_v44, %v388_v50  ;;  %v418_v2 = vmul.f32 0.0001984127, %v407_v32 }
  0xe8   : > { %v453_v3 = vmul.f32 %v429_v11, %v1411_v23  ;;  %v417_v4 = vadd.f32 %v416_v55, %v390_v56  ;;  %v435_v5 = vmul.f32 0.0001984127, %v424_v54  ;;  %v437_v7 = vmul.f32 0.0001984127, %v429_v11 }
  0xe9   : > { %v449_v8 = vadd.f32 %v448_v63, %v447_v59  ;;  %v450_v9 = vmul.f32 %v434_v62, %v1401_v19  ;;  %v455_v12 = vmul.f32 %v434_v62, %v1416_v25  ;;  %v457_v20 = vmul.f32 %v424_v54, %v1387_v13 }
  0xea   : > { %v454_v15 = vadd.f32 %v453_v3, %v452_v0  ;;  %v413_v24 = vadd.f32 %v412_v61, %v386_v57  ;;  %v441_v17 = vmul.f32 2.4801588e-05, %v424_v54  ;;  %v443_v60 = vmul.f32 2.4801588e-05, %v429_v11 }
  0xeb   : > { %v458_v22 = vmul.f32 %v429_v11, %v1390_v14  ;;  %v419_v6 = vadd.f32 %v418_v2, %v392_v58  ;;  %v439_v26 = vmul.f32 0.0001984127, %v434_v62  ;;  %v451_v27 = vadd.f32 %v450_v9, %v449_v8 }
  0xec   : > { %v456_v23 = vadd.f32 %v455_v12, %v454_v15  ;;  %v436_v28 = vadd.f32 %v435_v5, %v409_v18  ;;  %v445_v29 = vmul.f32 2.4801588e-05, %v434_v62  ;;  %v460_v31 = vmul.f32 %v434_v62, %v1393_v16 }
  0xed   : > { %v459_v30 = vadd.f32 %v458_v22, %v457_v20  ;;  %v438_v19 = vadd.f32 %v437_v7, %v411_v52  ;;  %v462_v32 = vmul.f32 2.4801588e-05, %v451_v27  ;;  %v468_v25 = vmul.f32 2.7557319e-06, %v451_v27 }
  0xee   : > { %v464_v33 = vmul.f32 2.4801588e-05, %v456_v23  ;;  %v442_v34 = vadd.f32 %v441_v17, %v415_v1  ;;  %v444_v13 = vadd.f32 %v443_v60, %v417_v4  ;;  %v470_v21 = vmul.f32 2.7557319e-06, %v456_v23 }
  0xef   : > { %v461_v35 = vadd.f32 %v460_v31, %v459_v30  ;;  %v440_v38 = vadd.f32 %v439_v26, %v413_v24  ;;  %v463_v37 = vadd.f32 %v462_v32, %v436_v28  ;;  %v446_v39 = vadd.f32 %v445_v29, %v419_v6 }
  0xf0   : > { %v465_v14 = vadd.f32 %v464_v33, %v438_v19  ;;  %v1490_v40 = vadd.f32 %v468_v25, %v442_v34  ;;  %v471_v41 = vadd.f32 %v470_v21, %v444_v13 }
  0xf1   : > { %v466_v10 = vmul.f32 2.4801588e-05, %v461_v35  ;;  %v498_v42 = vperm.slane %v463_v37, 0  ;;  %v500_v36 = vperm.slane %v463_v37, 1  ;;  %v503_v45 = vperm.slane %v463_v37, 2 }
  0xf2   : > { %v506_v16 = vperm.slane %v465_v14, 0  ;;  %v472_v46 = vmul.f32 2.7557319e-06, %v461_v35  ;;  %v482_v47 = vperm.slane %v471_v41, 0  ;;  %v484_v50 = vperm.slane %v471_v41, 1 }
  0xf3   : > { %v467_v43 = vadd.f32 %v466_v10, %v440_v38  ;;  %v487_v51 = vperm.slane %v471_v41, 2  ;;  %v499_v53 = vmul.f32 %v498_v42, %v463_v37  ;;  %v501_v44 = vmul.f32 %v500_v36, %v465_v14 }
  0xf4   : > { %v507_v54 = vmul.f32 %v506_v16, %v463_v37  ;;  %v483_v11 = vmul.f32 %v482_v47, %v463_v37  ;;  %v485_v56 = vmul.f32 %v484_v50, %v465_v14  ;;  %v508_v48 = vperm.slane %v465_v14, 1 }
  0xf5   : > { %v504_v55 = vmul.f32 %v503_v45, %v467_v43  ;;  %v488_v49 = vmul.f32 %v487_v51, %v467_v43  ;;  %v502_v57 = vadd.f32 %v501_v44, %v499_v53  ;;  %v511_v58 = vperm.slane %v465_v14, 2 }
  0xf6   : > { %v514_v18 = vperm.slane %v467_v43, 0  ;;  %v486_v59 = vadd.f32 %v485_v56, %v483_v11  ;;  %v509_v61 = vmul.f32 %v508_v48, %v465_v14  ;;  %v516_v62 = vperm.slane %v467_v43, 1 }
  0xf7   : > { %v519_v63 = vperm.slane %v467_v43, 2  ;;  %v473_v0 = vadd.f32 %v472_v46, %v446_v39  ;;  %v505_v52 = vadd.f32 %v504_v55, %v502_v57  ;;  %v526_v2 = vmul.f32 0.5, %v465_v14 }
  0xf8   : > { %v515_v1 = vmul.f32 %v514_v18, %v463_v37  ;;  %v489_v3 = vadd.f32 %v488_v49, %v486_v59  ;;  %v510_v4 = vadd.f32 %v509_v61, %v507_v54  ;;  %v512_v5 = vmul.f32 %v511_v58, %v467_v43 }
  0xf9   : > { %v517_v7 = vmul.f32 %v516_v62, %v465_v14  ;;  %v520_v8 = vmul.f32 %v519_v63, %v467_v43  ;;  %v527_v9 = vadd.f32 %v526_v2, %v471_v41  ;;  %v534_v15 = vmul.f32 2.0, %v463_v37 }
  0xfa   : > { %v536_v12 = vmul.f32 2.0, %v465_v14  ;;  %v513_v20 = vadd.f32 %v512_v5, %v510_v4  ;;  %v528_v17 = vmul.f32 0.5, %v489_v3  ;;  %v474_v60 = vperm.slane %v1490_v40, 0 }
  0xfb   : > { %v518_v24 = vadd.f32 %v517_v7, %v515_v1  ;;  %v538_v22 = vmul.f32 2.0, %v467_v43  ;;  %v476_v6 = vperm.slane %v1490_v40, 1  ;;  %v479_v26 = vperm.slane %v1490_v40, 2 }
  0xfc   : > { %v490_v27 = vperm.slane %v473_v0, 0  ;;  %v1495_v28 = vadd.f32 %v528_v17, %v527_v9  ;;  %v1497_v29 = vadd.f32 %v534_v15, %v505_v52  ;;  %v475_v30 = vmul.f32 %v474_v60, %v463_v37 }
  0xfd   : > { %v521_v23 = vadd.f32 %v520_v8, %v518_v24  ;;  %v1499_v31 = vadd.f32 %v536_v12, %v513_v20  ;;  %v477_v19 = vmul.f32 %v476_v6, %v465_v14  ;;  %v492_v33 = vperm.slane %v473_v0, 1 }
  0xfe   : > { %v491_v32 = vmul.f32 %v490_v27, %v463_v37  ;;  %v480_v25 = vmul.f32 %v479_v26, %v467_v43  ;;  %v495_v34 = vperm.slane %v473_v0, 2  ;;  %v522_v13 = vmul.f32 0.5, %v463_v37 }
  0xff   : > { %v530_v35 = vmul.f32 0.5, %v467_v43  ;;  %v478_v21 = vadd.f32 %v477_v19, %v475_v30  ;;  %v493_v38 = vmul.f32 %v492_v33, %v465_v14  ;;  %v548_v39 = vperm.slane %v1495_v28, 0 }
 0x100   : > { %v550_v10 = vperm.slane %v1495_v28, 1  ;;  %v1503_v41 = vadd.f32 %v538_v22, %v521_v23  ;;  %v496_v42 = vmul.f32 %v495_v34, %v467_v43  ;;  %v523_v36 = vadd.f32 %v522_v13, %v1490_v40 }
 0x101   : > { %v553_v45 = vperm.slane %v1495_v28, 2  ;;  %v481_v16 = vadd.f32 %v480_v25, %v478_v21  ;;  %v494_v46 = vadd.f32 %v493_v38, %v491_v32  ;;  %v549_v47 = vmul.f32 %v548_v39, %v1497_v29 }
 0x102   : > { %v551_v37 = vmul.f32 %v550_v10, %v1499_v31  ;;  %v531_v50 = vadd.f32 %v530_v35, %v473_v0  ;;  %v564_v14 = vperm.slane %v1497_v29, 0  ;;  %v566_v51 = vperm.slane %v1497_v29, 1 }
 0x103   : > { %v569_v53 = vperm.slane %v1497_v29, 2  ;;  %v497_v44 = vadd.f32 %v496_v42, %v494_v46  ;;  %v524_v54 = vmul.f32 0.5, %v481_v16  ;;  %v554_v43 = vmul.f32 %v553_v45, %v1503_v41 }
 0x104   : > { %v572_v40 = vperm.slane %v1499_v31, 0  ;;  %v552_v11 = vadd.f32 %v551_v37, %v549_v47  ;;  %v565_v56 = vmul.f32 %v564_v14, %v1497_v29  ;;  %v567_v55 = vmul.f32 %v566_v51, %v1499_v31 }
 0x105   : > { %v574_v48 = vperm.slane %v1499_v31, 1  ;;  %v525_v49 = vadd.f32 %v524_v54, %v523_v36  ;;  %v532_v57 = vmul.f32 0.5, %v497_v44  ;;  %v570_v58 = vmul.f32 %v569_v53, %v1503_v41 }
 0x106   : > { %v573_v18 = vmul.f32 %v572_v40, %v1497_v29  ;;  %v568_v59 = vadd.f32 %v567_v55, %v565_v56  ;;  %v577_v62 = vperm.slane %v1499_v31, 2  ;;  %v580_v63 = vperm.slane %v1503_v41, 0 }
 0x107   : > { %v575_v61 = vmul.f32 %v574_v48, %v1499_v31  ;;  %v533_v0 = vadd.f32 %v532_v57, %v531_v50  ;;  %v540_v52 = vperm.slane %v525_v49, 0  ;;  %v542_v1 = vperm.slane %v525_v49, 1 }
 0x108   : > { %v545_v2 = vperm.slane %v525_v49, 2  ;;  %v555_v3 = vadd.f32 %v554_v43, %v552_v11  ;;  %v571_v4 = vadd.f32 %v570_v58, %v568_v59  ;;  %v578_v7 = vmul.f32 %v577_v62, %v1503_v41 }
 0x109   : > { %v576_v5 = vadd.f32 %v575_v61, %v573_v18  ;;  %v541_v8 = vmul.f32 %v540_v52, %v1497_v29  ;;  %v543_v9 = vmul.f32 %v542_v1, %v1499_v31  ;;  %v556_v15 = vperm.slane %v533_v0, 0 }
 0x10a   : > { %v581_v12 = vmul.f32 %v580_v63, %v1497_v29  ;;  %v546_v20 = vmul.f32 %v545_v2, %v1503_v41  ;;  %v558_v24 = vperm.slane %v533_v0, 1  ;;  %v561_v17 = vperm.slane %v533_v0, 2 }
 0x10b   : > { %v582_v60 = vperm.slane %v1503_v41, 1  ;;  %v544_v22 = vadd.f32 %v543_v9, %v541_v8  ;;  %v557_v6 = vmul.f32 %v556_v15, %v1497_v29  ;;  %v585_v26 = vperm.slane %v1503_v41, 2 }
 0x10c   : > { %v588_v27 = vmul.f32 0.5, %v1497_v29  ;;  %v559_v23 = vmul.f32 %v558_v24, %v1499_v31  ;;  %v579_v30 = vadd.f32 %v578_v7, %v576_v5  ;;  %v592_v32 = vmul.f32 0.5, %v1499_v31 }
 0x10d   : > { %v583_v19 = vmul.f32 %v582_v60, %v1499_v31  ;;  %v547_v33 = vadd.f32 %v546_v20, %v544_v22  ;;  %v562_v25 = vmul.f32 %v561_v17, %v1503_v41  ;;  %v586_v34 = vmul.f32 %v585_v26, %v1503_v41 }
 0x10e   : > { %v594_v13 = vmul.f32 0.5, %v555_v3  ;;  %v560_v35 = vadd.f32 %v559_v23, %v557_v6  ;;  %v593_v38 = vadd.f32 %v592_v32, %v1495_v28  ;;  %v596_v39 = vmul.f32 0.5, %v1503_v41 }
 0x10f   : > { %v584_v21 = vadd.f32 %v583_v19, %v581_v12  ;;  %v589_v10 = vadd.f32 %v588_v27, %v525_v49  ;;  %v590_v42 = vmul.f32 0.5, %v547_v33  ;;  %v600_v36 = vmul.f32 2.0, %v1497_v29 }
 0x110   : > { %v602_v45 = vmul.f32 2.0, %v1499_v31  ;;  %v563_v16 = vadd.f32 %v562_v25, %v560_v35  ;;  %v1540_v47 = vadd.f32 %v594_v13, %v593_v38  ;;  %v604_v37 = vmul.f32 2.0, %v1503_v41 }
 0x111   : > { %v587_v46 = vadd.f32 %v586_v34, %v584_v21  ;;  %v591_v50 = vadd.f32 %v590_v42, %v589_v10  ;;  %v597_v14 = vadd.f32 %v596_v39, %v533_v0  ;;  %v601_v51 = vadd.f32 %v600_v36, %v571_v4 }
 0x112   : > { %v603_v53 = vadd.f32 %v602_v45, %v579_v30  ;;  %v598_v44 = vmul.f32 0.5, %v563_v16  ;;  %v614_v54 = vperm.slane %v1540_v47, 0  ;;  %v616_v43 = vperm.slane %v1540_v47, 1 }
 0x113   : > { %v605_v28 = vadd.f32 %v604_v37, %v587_v46  ;;  %v606_v40 = vperm.slane %v591_v50, 0  ;;  %v608_v29 = vperm.slane %v591_v50, 1  ;;  %v611_v11 = vperm.slane %v591_v50, 2 }
 0x114   : > { %v619_v31 = vperm.slane %v1540_v47, 2  ;;  %v599_v56 = vadd.f32 %v598_v44, %v597_v14  ;;  %v615_v55 = vmul.f32 %v614_v54, %v601_v51  ;;  %v617_v48 = vmul.f32 %v616_v43, %v603_v53 }
 0x115   : > { %v630_v49 = vperm.slane %v601_v51, 0  ;;  %v607_v41 = vmul.f32 %v606_v40, %v601_v51  ;;  %v609_v57 = vmul.f32 %v608_v29, %v603_v53  ;;  %v612_v58 = vmul.f32 %v611_v11, %v605_v28 }
 0x116   : > { %v620_v18 = vmul.f32 %v619_v31, %v605_v28  ;;  %v618_v59 = vadd.f32 %v617_v48, %v615_v55  ;;  %v622_v61 = vperm.slane %v599_v56, 0  ;;  %v624_v62 = vperm.slane %v599_v56, 1 }
 0x117   : > { %v627_v63 = vperm.slane %v599_v56, 2  ;;  %v610_v0 = vadd.f32 %v609_v57, %v607_v41  ;;  %v631_v52 = vmul.f32 %v630_v49, %v601_v51  ;;  %v632_v1 = vperm.slane %v601_v51, 1 }
 0x118   : > { %v635_v2 = vperm.slane %v601_v51, 2  ;;  %v621_v3 = vadd.f32 %v620_v18, %v618_v59  ;;  %v623_v4 = vmul.f32 %v622_v61, %v601_v51  ;;  %v625_v5 = vmul.f32 %v624_v62, %v603_v53 }
 0x119   : > { %v628_v7 = vmul.f32 %v627_v63, %v605_v28  ;;  %v613_v8 = vadd.f32 %v612_v58, %v610_v0  ;;  %v633_v9 = vmul.f32 %v632_v1, %v603_v53  ;;  %v638_v12 = vperm.slane %v603_v53, 0 }
 0x11a   : > { %v636_v15 = vmul.f32 %v635_v2, %v605_v28  ;;  %v626_v20 = vadd.f32 %v625_v5, %v623_v4  ;;  %v640_v24 = vperm.slane %v603_v53, 1  ;;  %v643_v17 = vperm.slane %v603_v53, 2 }
 0x11b   : > { %v646_v60 = vperm.slane %v605_v28, 0  ;;  %v634_v22 = vadd.f32 %v633_v9, %v631_v52  ;;  %v639_v6 = vmul.f32 %v638_v12, %v601_v51  ;;  %v648_v26 = vperm.slane %v605_v28, 1 }
 0x11c   : > { %v651_v27 = vperm.slane %v605_v28, 2  ;;  %v629_v23 = vadd.f32 %v628_v7, %v626_v20  ;;  %v641_v30 = vmul.f32 %v640_v24, %v603_v53  ;;  %v644_v19 = vmul.f32 %v643_v17, %v605_v28 }
 0x11d   : > { %v647_v32 = vmul.f32 %v646_v60, %v601_v51  ;;  %v637_v33 = vadd.f32 %v636_v15, %v634_v22  ;;  %v649_v25 = vmul.f32 %v648_v26, %v603_v53  ;;  %v654_v13 = vmul.f32 0.5, %v601_v51 }
 0x11e   : > { %v652_v34 = vmul.f32 %v651_v27, %v605_v28  ;;  %v642_v35 = vadd.f32 %v641_v30, %v639_v6  ;;  %v656_v21 = vmul.f32 0.5, %v613_v8  ;;  %v658_v38 = vmul.f32 0.5, %v603_v53 }
 0x11f   : > { %v660_v39 = vmul.f32 0.5, %v621_v3  ;;  %v650_v10 = vadd.f32 %v649_v25, %v647_v32  ;;  %v655_v42 = vadd.f32 %v654_v13, %v591_v50  ;;  %v662_v36 = vmul.f32 0.5, %v605_v28 }
 0x120   : > { %v664_v45 = vmul.f32 0.5, %v629_v23  ;;  %v645_v16 = vadd.f32 %v644_v19, %v642_v35  ;;  %v659_v46 = vadd.f32 %v658_v38, %v1540_v47  ;;  %v666_v37 = vmul.f32 2.0, %v601_v51 }
 0x121   : > { %v668_v14 = vmul.f32 2.0, %v603_v53  ;;  %v653_v44 = vadd.f32 %v652_v34, %v650_v10  ;;  %v657_v54 = vadd.f32 %v656_v21, %v655_v42  ;;  %v663_v43 = vadd.f32 %v662_v36, %v599_v56 }
 0x122   : > { %v670_v40 = vmul.f32 2.0, %v605_v28  ;;  %v661_v29 = vadd.f32 %v660_v39, %v659_v46  ;;  %v667_v11 = vadd.f32 %v666_v37, %v637_v33 }
 0x123   : > { %v669_v31 = vadd.f32 %v668_v14, %v645_v16  ;;  %v665_v55 = vadd.f32 %v664_v45, %v663_v43  ;;  %v672_v49 = vperm.slane %v657_v54, 0  ;;  %v674_v41 = vperm.slane %v657_v54, 1 }
 0x124   : > { %v671_v48 = vadd.f32 %v670_v40, %v653_v44  ;;  %v677_v57 = vperm.slane %v657_v54, 2  ;;  %v680_v50 = vperm.slane %v661_v29, 0  ;;  %v682_v58 = vperm.slane %v661_v29, 1 }
 0x125   : > { %v685_v18 = vperm.slane %v661_v29, 2  ;;  %v673_v59 = vmul.f32 %v672_v49, %v667_v11  ;;  %v675_v61 = vmul.f32 %v674_v41, %v669_v31  ;;  %v688_v47 = vperm.slane %v665_v55, 0 }
 0x126   : > { %v690_v51 = vperm.slane %v665_v55, 1  ;;  %v678_v53 = vmul.f32 %v677_v57, %v671_v48  ;;  %v681_v62 = vmul.f32 %v680_v50, %v667_v11  ;;  %v683_v63 = vmul.f32 %v682_v58, %v669_v31 }
 0x127   : > { %v686_v56 = vmul.f32 %v685_v18, %v671_v48  ;;  %v676_v28 = vadd.f32 %v675_v61, %v673_v59  ;;  %v689_v0 = vmul.f32 %v688_v47, %v667_v11  ;;  %v693_v1 = vperm.slane %v665_v55, 2 }
 0x128   : > { %v691_v52 = vmul.f32 %v690_v51, %v669_v31  ;;  %v684_v2 = vadd.f32 %v683_v63, %v681_v62  ;;  %v696_v3 = vperm.slane %v667_v11, 0  ;;  %v698_v4 = vperm.slane %v667_v11, 1 }
 0x129   : > { %v701_v5 = vperm.slane %v667_v11, 2  ;;  %v679_v7 = vadd.f32 %v678_v53, %v676_v28  ;;  %v694_v9 = vmul.f32 %v693_v1, %v671_v48  ;;  %v704_v15 = vperm.slane %v669_v31, 0 }
 0x12a   : > { %v692_v8 = vadd.f32 %v691_v52, %v689_v0  ;;  %v687_v12 = vadd.f32 %v686_v56, %v684_v2  ;;  %v697_v20 = vmul.f32 %v696_v3, %v667_v11  ;;  %v699_v24 = vmul.f32 %v698_v4, %v669_v31 }
 0x12b   : > { %v702_v17 = vmul.f32 %v701_v5, %v671_v48  ;;  %v705_v22 = vmul.f32 %v704_v15, %v667_v11  ;;  %v706_v6 = vperm.slane %v669_v31, 1  ;;  %v709_v26 = vperm.slane %v669_v31, 2 }
 0x12c   : > { %v695_v60 = vadd.f32 %v694_v9, %v692_v8  ;;  %v700_v27 = vadd.f32 %v699_v24, %v697_v20  ;;  %v712_v23 = vperm.slane %v671_v48, 0  ;;  %v714_v30 = vperm.slane %v671_v48, 1 }
 0x12d   : > { %v717_v19 = vperm.slane %v671_v48, 2  ;;  %v707_v32 = vmul.f32 %v706_v6, %v669_v31  ;;  %v710_v33 = vmul.f32 %v709_v26, %v671_v48  ;;  %v720_v25 = vmul.f32 0.5, %v667_v11 }
 0x12e   : > { %v722_v34 = vmul.f32 0.5, %v679_v7  ;;  %v703_v13 = vadd.f32 %v702_v17, %v700_v27  ;;  %v713_v35 = vmul.f32 %v712_v23, %v667_v11  ;;  %v715_v21 = vmul.f32 %v714_v30, %v669_v31 }
 0x12f   : > { %v718_v38 = vmul.f32 %v717_v19, %v671_v48  ;;  %v708_v39 = vadd.f32 %v707_v32, %v705_v22  ;;  %v721_v10 = vadd.f32 %v720_v25, %v657_v54  ;;  %v724_v42 = vmul.f32 0.5, %v669_v31 }
 0x130   : > { %v726_v36 = vmul.f32 0.5, %v687_v12  ;;  %v716_v45 = vadd.f32 %v715_v21, %v713_v35  ;;  %v728_v16 = vmul.f32 0.5, %v671_v48  ;;  %v730_v46 = vmul.f32 0.5, %v695_v60 }
 0x131   : > { %v732_v37 = vmul.f32 2.0, %v667_v11  ;;  %v711_v14 = vadd.f32 %v710_v33, %v708_v39  ;;  %v723_v44 = vadd.f32 %v722_v34, %v721_v10  ;;  %v725_v43 = vadd.f32 %v724_v42, %v661_v29 }
 0x132   : > { %v734_v40 = vmul.f32 2.0, %v669_v31  ;;  %v719_v49 = vadd.f32 %v718_v38, %v716_v45  ;;  %v729_v41 = vadd.f32 %v728_v16, %v665_v55  ;;  %v736_v50 = vmul.f32 2.0, %v671_v48 }
 0x133   : > { %v733_v57 = vadd.f32 %v732_v37, %v703_v13  ;;  %v727_v58 = vadd.f32 %v726_v36, %v725_v43  ;;  %v738_v59 = vperm.slane %v723_v44, 0  ;;  %v740_v61 = vperm.slane %v723_v44, 1 }
 0x134   : > { %v735_v18 = vadd.f32 %v734_v40, %v711_v14  ;;  %v731_v47 = vadd.f32 %v730_v46, %v729_v41  ;;  %v737_v54 = vadd.f32 %v736_v50, %v719_v49  ;;  %v743_v51 = vperm.slane %v723_v44, 2 }
 0x135   : > { %v762_v53 = vperm.slane %v733_v57, 0  ;;  %v739_v62 = vmul.f32 %v738_v59, %v733_v57  ;;  %v746_v56 = vperm.slane %v727_v58, 0  ;;  %v748_v11 = vperm.slane %v727_v58, 1 }
 0x136   : > { %v741_v63 = vmul.f32 %v740_v61, %v735_v18  ;;  %v744_v28 = vmul.f32 %v743_v51, %v737_v54  ;;  %v751_v0 = vperm.slane %v727_v58, 2  ;;  %v754_v29 = vperm.slane %v731_v47, 0 }
 0x137   : > { %v756_v31 = vperm.slane %v731_v47, 1  ;;  %v747_v55 = vmul.f32 %v746_v56, %v733_v57  ;;  %v749_v1 = vmul.f32 %v748_v11, %v735_v18  ;;  %v759_v48 = vperm.slane %v731_v47, 2 }
 0x138   : > { %v742_v52 = vadd.f32 %v741_v63, %v739_v62  ;;  %v752_v2 = vmul.f32 %v751_v0, %v737_v54  ;;  %v755_v3 = vmul.f32 %v754_v29, %v733_v57  ;;  %v763_v5 = vmul.f32 %v762_v53, %v733_v57 }
 0x139   : > { %v757_v4 = vmul.f32 %v756_v31, %v735_v18  ;;  %v750_v8 = vadd.f32 %v749_v1, %v747_v55  ;;  %v760_v9 = vmul.f32 %v759_v48, %v737_v54  ;;  %v764_v15 = vperm.slane %v733_v57, 1 }
 0x13a   : > { %v745_v7 = vadd.f32 %v744_v28, %v742_v52  ;;  %v767_v20 = vperm.slane %v733_v57, 2  ;;  %v770_v24 = vperm.slane %v735_v18, 0  ;;  %v772_v17 = vperm.slane %v735_v18, 1 }
 0x13b   : > { %v758_v12 = vadd.f32 %v757_v4, %v755_v3  ;;  %v753_v60 = vadd.f32 %v752_v2, %v750_v8  ;;  %v765_v22 = vmul.f32 %v764_v15, %v735_v18  ;;  %v775_v6 = vperm.slane %v735_v18, 2 }
 0x13c   : > { %v778_v26 = vperm.slane %v737_v54, 0  ;;  %v768_v23 = vmul.f32 %v767_v20, %v737_v54  ;;  %v771_v30 = vmul.f32 %v770_v24, %v733_v57  ;;  %v773_v19 = vmul.f32 %v772_v17, %v735_v18  ;;  %v874_v20 = vpop.permute.xlu1 %873 }
 0x13d   : > { %v761_v27 = vadd.f32 %v760_v9, %v758_v12  ;;  %v766_v32 = vadd.f32 %v765_v22, %v763_v5  ;;  %v776_v33 = vmul.f32 %v775_v6, %v737_v54  ;;  %v780_v34 = vperm.slane %v737_v54, 1  ;;  %v1076_v12 = vld [vmem:[%s210_s14] ss:$0 sm:$0xff]  ;;  %v870_v6 = vld [vmem:[%s1365_s5] sm:$0x7] }
 0x13e   : > { %v779_v25 = vmul.f32 %v778_v26, %v733_v57  ;;  %v774_v13 = vadd.f32 %v773_v19, %v771_v30  ;;  %v783_v35 = vperm.slane %v737_v54, 2  ;;  %v786_v21 = vmul.f32 0.5, %v733_v57 }
 0x13f   : > { %v788_v38 = vmul.f32 0.5, %v745_v7  ;;  %v769_v39 = vadd.f32 %v768_v23, %v766_v32  ;;  %v781_v10 = vmul.f32 %v780_v34, %v735_v18  ;;  %v790_v42 = vmul.f32 0.5, %v735_v18 }
 0x140   : > { %v792_v36 = vmul.f32 0.5, %v753_v60  ;;  %v777_v45 = vadd.f32 %v776_v33, %v774_v13  ;;  %v784_v16 = vmul.f32 %v783_v35, %v737_v54  ;;  %v787_v46 = vadd.f32 %v786_v21, %v723_v44 }
 0x141   : > { %v794_v37 = vmul.f32 0.5, %v737_v54  ;;  %v782_v14 = vadd.f32 %v781_v10, %v779_v25  ;;  %v791_v43 = vadd.f32 %v790_v42, %v727_v58  ;;  %v796_v40 = vmul.f32 0.5, %v761_v27 }
 0x142   : > { %v798_v49 = vmul.f32 2.0, %v733_v57  ;;  %v789_v41 = vadd.f32 %v788_v38, %v787_v46  ;;  %v800_v59 = vmul.f32 2.0, %v735_v18  ;;  %v802_v62 = vmul.f32 2.0, %v737_v54 }
 0x143   : > { %v795_v50 = vadd.f32 %v794_v37, %v731_v47  ;;  %v785_v61 = vadd.f32 %v784_v16, %v782_v14  ;;  %v1547_v51 = vadd.f32 %v792_v36, %v791_v43  ;;  %v879_v13 = vmul.f32 %v1076_v12, %v874_v20 }
 0x144   : > { %v1549_v53 = vadd.f32 %v798_v49, %v769_v39  ;;  %v1553_v56 = vadd.f32 %v800_v59, %v777_v45  ;;  %v804_v11 = vperm.slane %v789_v41, 0  ;;  %v806_v44 = vperm.slane %v789_v41, 1 }
 0x145   : > { %v1551_v63 = vadd.f32 %v796_v40, %v795_v50  ;;  %v1555_v28 = vadd.f32 %v802_v62, %v785_v61  ;;  %v809_v58 = vperm.slane %v789_v41, 2  ;;  %v812_v57 = vperm.slane %v1547_v51, 0 }
 0x146   : > { %v814_v47 = vperm.slane %v1547_v51, 1  ;;  %v805_v18 = vmul.f32 %v804_v11, %v1549_v53  ;;  %v807_v0 = vmul.f32 %v806_v44, %v1553_v56  ;;  %v817_v54 = vperm.slane %v1547_v51, 2 }
 0x147   : > { %v820_v29 = vperm.slane %v1551_v63, 0  ;;  %v813_v31 = vmul.f32 %v812_v57, %v1549_v53  ;;  %v822_v55 = vperm.slane %v1551_v63, 1  ;;  %v810_v48 = vmul.f32 %v809_v58, %v1555_v28 }
 0x148   : > { %v815_v52 = vmul.f32 %v814_v47, %v1553_v56  ;;  %v808_v1 = vadd.f32 %v807_v0, %v805_v18  ;;  %v818_v3 = vmul.f32 %v817_v54, %v1555_v28  ;;  %v828_v4 = vperm.slane %v1549_v53, 0 }
 0x149   : > { %v830_v5 = vperm.slane %v1549_v53, 1  ;;  %v821_v8 = vmul.f32 %v820_v29, %v1549_v53  ;;  %v833_v9 = vperm.slane %v1549_v53, 2  ;;  %v836_v15 = vperm.slane %v1553_v56, 0 }
 0x14a   : > { %v816_v2 = vadd.f32 %v815_v52, %v813_v31  ;;  %v811_v7 = vadd.f32 %v810_v48, %v808_v1  ;;  %v823_v24 = vmul.f32 %v822_v55, %v1553_v56  ;;  %v825_v17 = vperm.slane %v1551_v63, 2 }
 0x14b   : > { %v829_v60 = vmul.f32 %v828_v4, %v1549_v53  ;;  %v831_v22 = vmul.f32 %v830_v5, %v1553_v56  ;;  %v837_v27 = vmul.f32 %v836_v15, %v1549_v53  ;;  %v838_v23 = vperm.slane %v1553_v56, 1 }
 0x14c   : > { %v819_v26 = vadd.f32 %v818_v3, %v816_v2  ;;  %v841_v30 = vperm.slane %v1553_v56, 2  ;;  %v834_v32 = vmul.f32 %v833_v9, %v1555_v28  ;;  %v852_v33 = vmul.f32 0.5, %v1549_v53 }
 0x14d   : > { %v832_v19 = vadd.f32 %v831_v22, %v829_v60  ;;  %v854_v25 = vmul.f32 0.5, %v811_v7  ;;  %v839_v34 = vmul.f32 %v838_v23, %v1553_v56  ;;  %v881_v35 = vperm.slane %v870_v6, 0 }
 0x14e   : > { %v824_v21 = vadd.f32 %v823_v24, %v821_v8  ;;  %v853_v39 = vadd.f32 %v852_v33, %v789_v41  ;;  %v826_v10 = vmul.f32 %v825_v17, %v1555_v28  ;;  %v842_v36 = vmul.f32 %v841_v30, %v1555_v28 }
 0x14f   : > { %v835_v38 = vadd.f32 %v834_v32, %v832_v19  ;;  %v840_v42 = vadd.f32 %v839_v34, %v837_v27  ;;  %v864_v45 = vmul.f32 2.0, %v1549_v53  ;;  %v856_v46 = vmul.f32 0.5, %v1553_v56 }
 0x150   : > { %v855_v16 = vadd.f32 %v854_v25, %v853_v39  ;;  %v858_v37 = vmul.f32 0.5, %v819_v26  ;;  %v884_v14 = vperm.slane %v879_v13, 0  ;;  %v866_v49 = vmul.f32 2.0, %v1553_v56 }
 0x151   : > { %v843_v43 = vadd.f32 %v842_v36, %v840_v42  ;;  %v865_v40 = vadd.f32 %v864_v45, %v835_v38  ;;  %v880_v50 = vadd.f32 %v879_v13, %v870_v6  ;;  %v887_v59 = vperm.slane %v870_v6, 1 }
 0x152   : > { %v827_v61 = vadd.f32 %v826_v10, %v824_v21  ;;  %v857_v41 = vadd.f32 %v856_v46, %v1547_v51  ;;  %v844_v62 = vperm.slane %v1555_v28, 0  ;;  %v885_v58 = vmul.f32 %v884_v14, %v855_v16 }
 0x153   : > { %v867_v11 = vadd.f32 %v866_v49, %v843_v43  ;;  %v882_v44 = vmul.f32 %v881_v35, %v865_v40  ;;  %v846_v57 = vperm.slane %v1555_v28, 1  ;;  %v890_v18 = vperm.slane %v879_v13, 1 }
 0x154   : > { %v859_v47 = vadd.f32 %v858_v37, %v857_v41  ;;  %v845_v0 = vmul.f32 %v844_v62, %v1549_v53  ;;  %v849_v54 = vperm.slane %v1555_v28, 2  ;;  %v860_v52 = vmul.f32 0.5, %v1555_v28 }
 0x155   : > { %v883_v29 = vadd.f32 %v882_v44, %v880_v50  ;;  %v847_v31 = vmul.f32 %v846_v57, %v1553_v56  ;;  %v862_v51 = vmul.f32 0.5, %v827_v61  ;;  %v888_v1 = vmul.f32 %v887_v59, %v867_v11 }
 0x156   : > { %v850_v2 = vmul.f32 %v849_v54, %v1555_v28  ;;  %v861_v3 = vadd.f32 %v860_v52, %v1551_v63  ;;  %v891_v4 = vmul.f32 %v890_v18, %v859_v47  ;;  %v868_v7 = vmul.f32 2.0, %v1555_v28 }
 0x157   : > { %v886_v55 = vadd.f32 %v885_v58, %v883_v29  ;;  %v848_v48 = vadd.f32 %v847_v31, %v845_v0  ;;  %v893_v8 = vperm.slane %v870_v6, 2  ;;  %v896_v15 = vperm.slane %v879_v13, 2 }
 0x158   : > { %v863_v56 = vadd.f32 %v862_v51, %v861_v3 }
 0x159   : > { %v889_v5 = vadd.f32 %v888_v1, %v886_v55  ;;  %v851_v53 = vadd.f32 %v850_v2, %v848_v48 }
 0x15a   : > { %v897_v63 = vmul.f32 %v896_v15, %v863_v56 }
 0x15b   : > { %v892_v9 = vadd.f32 %v891_v4, %v889_v5  ;;  %v869_v12 = vadd.f32 %v868_v7, %v851_v53 }
 0x15d   : > { %v894_v20 = vmul.f32 %v893_v8, %v869_v12 }
 0x15f   : > { %v895_v24 = vadd.f32 %v894_v20, %v892_v9 }
 0x161   : > { %v898_v17 = vadd.f32 %v897_v63, %v895_v24 }
 0x163   : > { %899 = vst [vmem:[%s249_s9] sm:$0x7] %v898_v17 }
 0x164   : > { %1164 = shalt.err (!%p1161_p0)
}
 0x165   : > { %1021 = dma.vmem_to_hbm [thread:$0]  (%p1287_p11), %s914_s12, 64, %s916_s19, %s901_s11  }
 0x166 PF: > { %s927_s29 = sand.u32 1, %s1195_s15   ;;  %p1649_p1 = scmp.ge.s32.totalorder %s1207_s18, 2 }
 0x167   : > { %s928_s20 = scalar_lea.sflag [#allocation4], %s927_s29 }
 0x168   : > { %p1031_p4 = pnand %p1649_p1, %p1291_p12 }
 0x16a   : > { %p1032_p7 = pneg %p1031_p4 }
 0x16c   : > { %1190 = dma.done.wait (%p1032_p7), %s928_s20, 64  }
 0x16d   : > { %1192 = vsyncadd (%p1032_p7), %s928_s20, 4294967232  ;;  %p20_p5 = scmp.ge.s32.totalorder %s1262_s21, 4   ;;  %s1650_s15 = smov %s1199_s16 }
 0x16e   : > { %s1651_s16 = smov %s1203_s17  ;;  %s1652_s17 = smov %s1274_s24 }
 0x16f   : > { %s1653_s18 = smov %s1262_s21  ;;  %22 = sbr.rel (!%p20_p5) target bundleno = 9 (0x9), region = 94 }
 0x174   :  { %934 = vsyncpa [#allocation3], 1 }
 0x175   :  { %936 = vsyncpa [#allocation3 + $0x1], 1 }
 0x176   :  { %937 = vsyncpa [#allocation6], 1 }
 0x177   :  { %939 = vsyncpa [#allocation6 + $0x1], 1 }
 0x178   :  { %940 = vsyncpa [#allocation4], 1 }
 0x179   :  { %942 = vsyncpa [#allocation4 + $0x1], 1 }

</bundles_post_ra>
